<compile_context>
chip_gen: v6e
topology: v6e:2x2x1
jax: 0.10.0
libtpu: 0.0.40
codegen_flags: <defaults>
</compile_context>

<pallas_src>
import jax
import jax.numpy as jnp
from jax.experimental import pallas as pl
from jax.experimental.pallas import tpu as pltpu

_LANE = 128


def _round_up(v, m=_LANE):
    return ((v + m - 1) // m) * m


def _selective_gcn_kernel(a_ref, x_ref, sel_ref,
                          w0_ref, b0_ref, w1_ref, b1_ref, w2_ref, b2_ref,
                          out_ref, h1_ref):
    G = sel_ref.shape[0]
    Np = x_ref.shape[0]

    # Hoist bias loads (broadcast sources) out of the unrolled per-graph loops.
    b0 = b0_ref[...]
    b1 = b1_ref[...]
    b2 = b2_ref[...]

    # ---- Layer 0 -----------------------------------------------------------
    # Graph-independent projection x @ W0, computed exactly once.
    xw0 = jnp.dot(x_ref[...], w0_ref[...], preferred_element_type=jnp.float32)
    xw0_bf = xw0.astype(jnp.bfloat16)

    # Propagation for all G graphs in one stacked MXU call:
    # A_stacked [G*Np, Np] @ xw0 [Np, Hp] -> [G*Np, Hp].
    h0 = jnp.dot(a_ref[...], xw0_bf, preferred_element_type=jnp.float32)
    h0 = jnp.maximum(h0 + b0, 0.0)
    # TODO(synk): nn.Dropout is identity in eval mode; training-mode dropout not modeled.

    # ---- Layer 1 -----------------------------------------------------------
    # Stacked projection (shared W1), one MXU call for all graphs.
    hw1 = jnp.dot(h0.astype(jnp.bfloat16), w1_ref[...],
                  preferred_element_type=jnp.float32).astype(jnp.bfloat16)

    # Per-graph propagation A_g @ hw1_g; staged through a bf16 VMEM scratch so
    # the unrolled loop does not carry large live vreg ranges.
    for g in range(G):
        rows = pl.ds(g * Np, Np)
        h1_g = jnp.dot(a_ref[rows, :], hw1[g * Np:(g + 1) * Np, :],
                       preferred_element_type=jnp.float32)
        h1_ref[rows, :] = jnp.maximum(h1_g + b1, 0.0).astype(jnp.bfloat16)

    # ---- Layer 2 (output) ---------------------------------------------------
    # Stacked projection (shared W2), one MXU call for all graphs.
    hw2 = jnp.dot(h1_ref[...], w2_ref[...],
                  preferred_element_type=jnp.float32).astype(jnp.bfloat16)

    # Per-graph propagation + per-node one-hot selection, accumulated directly
    # into the VMEM-resident output block.
    out_ref[...] = jnp.zeros_like(out_ref)
    for g in range(G):
        rows = pl.ds(g * Np, Np)
        h2_g = jnp.dot(a_ref[rows, :], hw2[g * Np:(g + 1) * Np, :],
                       preferred_element_type=jnp.float32) + b2
        out_ref[...] += sel_ref[g] * h2_g


def prepare_selective_gcn_inputs(a_norm, x, mask, params):
    """One-time setup: lane-pad, cast to bf16 and build the one-hot selector.

    Kept out of the per-call path so the full f32 A read + padded bf16 write
    (the dominant HBM traffic for this kernel size) is paid once, not per
    forward pass.
    """
    G, N, _ = a_norm.shape
    Fin = x.shape[1]
    (w0, b0), (w1, b1), (w2, b2) = params
    H = w0.shape[1]
    Fout = w2.shape[1]
    Np, Finp, Hp, Foutp = map(_round_up, (N, Fin, H, Fout))

    # Adjacency stacked as [G*Np, Np] bf16 (zero pad rows/cols keep padding
    # from leaking into real rows).
    a_p = (jnp.zeros((G, Np, Np), jnp.bfloat16)
           .at[:, :N, :N].set(a_norm.astype(jnp.bfloat16))
           .reshape(G * Np, Np))
    x_p = jnp.zeros((Np, Finp), jnp.bfloat16).at[:N, :Fin].set(x.astype(jnp.bfloat16))
    w0_p = jnp.zeros((Finp, Hp), jnp.bfloat16).at[:Fin, :H].set(w0.astype(jnp.bfloat16))
    b0_p = jnp.zeros((1, Hp), jnp.float32).at[:, :H].set(b0.reshape(1, H))
    w1_p = jnp.zeros((Hp, Hp), jnp.bfloat16).at[:H, :H].set(w1.astype(jnp.bfloat16))
    b1_p = jnp.zeros((1, Hp), jnp.float32).at[:, :H].set(b1.reshape(1, H))
    w2_p = jnp.zeros((Hp, Foutp), jnp.bfloat16).at[:H, :Fout].set(w2.astype(jnp.bfloat16))
    b2_p = jnp.zeros((1, Foutp), jnp.float32).at[:, :Fout].set(b2.reshape(1, Fout))

    # f32 one-hot selection mask [G, Np, 1]; padding rows select nothing.
    onehot = (mask[None, :] == jnp.arange(G, dtype=mask.dtype)[:, None]
              ).astype(jnp.float32)                                    # [G, N]
    sel_p = jnp.zeros((G, Np, 1), jnp.float32).at[:, :N, 0].set(onehot)

    operands = (a_p, x_p, sel_p, w0_p, b0_p, w1_p, b1_p, w2_p, b2_p)
    dims = dict(G=G, N=N, Fout=Fout, Np=Np, Hp=Hp, Foutp=Foutp)
    return operands, dims


def selective_gcn_padded(operands, dims):
    """Per-call path: a single pallas_call on the pre-padded operands."""
    G, N, Fout = dims["G"], dims["N"], dims["Fout"]
    Np, Hp, Foutp = dims["Np"], dims["Hp"], dims["Foutp"]

    full = lambda shape: pl.BlockSpec(shape, lambda i: (0,) * len(shape))
    in_specs = [full(op.shape) for op in operands]

    out_p = pl.pallas_call(
        _selective_gcn_kernel,
        out_shape=jax.ShapeDtypeStruct((Np, Foutp), jnp.float32),
        grid_spec=pltpu.PrefetchScalarGridSpec(
            num_scalar_prefetch=0,
            grid=(1,),                                   # single-step, all-resident
            in_specs=in_specs,
            out_specs=pl.BlockSpec((Np, Foutp), lambda i: (0, 0)),
            scratch_shapes=[pltpu.VMEM((G * Np, Hp), jnp.bfloat16)],
        ),
        compiler_params=pltpu.CompilerParams(
            dimension_semantics=("arbitrary",),
            vmem_limit_bytes=32 * 1024 * 1024),          # explicit budget (v7x-safe)
    )(*operands)

    return out_p[:N, :Fout]


def selective_gcn(a_norm, x, mask, params):
    """Convenience one-shot wrapper (prepare + call)."""
    operands, dims = prepare_selective_gcn_inputs(a_norm, x, mask, params)
    return selective_gcn_padded(operands, dims)


def _normalize_adj(adj):
    """DGL GraphConv norm='both' with allow_zero_in_degree=True."""
    deg = adj.sum(axis=1)
    inv_sqrt = jnp.where(deg > 0, 1.0 / jnp.sqrt(jnp.maximum(deg, 1e-12)), 0.0)
    return inv_sqrt[:, None] * adj * inv_sqrt[None, :]


def _reference(a_norm, x, mask, params):
    outs = []
    for g in range(a_norm.shape[0]):
        h = x
        for li, (w, b) in enumerate(params):
            h = a_norm[g] @ (h @ w) + b
            if li != len(params) - 1:
                h = jnp.maximum(h, 0.0)
        outs.append(h)
    h_out = jnp.stack(outs, axis=0)
    return h_out[mask, jnp.arange(x.shape[0]), :]


if __name__ == "__main__":
    key = jax.random.PRNGKey(0)

    # Small shapes implied by the module: G graph versions, N nodes,
    # in_feats=32, h_feats=32, out_feats=16, n_layers=2 -> 3 GraphConv layers.
    G, N = 2, 64
    in_feats, h_feats, out_feats = 32, 32, 16

    k_adj, k_x, k_mask, k_w0, k_w1, k_w2 = jax.random.split(key, 6)

    # Deterministic random undirected graphs (dense adjacency) + normalization.
    raw = jax.random.uniform(k_adj, (G, N, N))
    adj = (raw < 0.1).astype(jnp.float32)
    adj = jnp.maximum(adj, jnp.swapaxes(adj, 1, 2))          # symmetrize
    a_norm = jax.vmap(_normalize_adj)(adj)

    x = jax.random.normal(k_x, (N, in_feats), dtype=jnp.float32)
    mask = jax.random.randint(k_mask, (N,), 0, G, dtype=jnp.int32)

    # Deterministic Glorot-ish weight init, zero bias (GraphConv defaults).
    def glorot(k, shape):
        fan_in, fan_out = shape
        lim = jnp.sqrt(6.0 / (fan_in + fan_out))
        return jax.random.uniform(k, shape, jnp.float32, -lim, lim)

    params = [
        (glorot(k_w0, (in_feats, h_feats)), jnp.zeros((1, h_feats), jnp.float32)),
        (glorot(k_w1, (h_feats, h_feats)), jnp.zeros((1, h_feats), jnp.float32)),
        (glorot(k_w2, (h_feats, out_feats)), jnp.zeros((1, out_feats), jnp.float32)),
    ]

    # One-time preparation (padding / bf16 cast / one-hot mask), then the
    # per-call path is just the kernel.
    operands, dims = prepare_selective_gcn_inputs(a_norm, x, mask, params)
    operands = jax.block_until_ready(operands)

    out = selective_gcn_padded(operands, dims)
    out = jax.block_until_ready(out)

    ref = _reference(a_norm, x, mask, params)
    assert out.shape == (N, out_feats)
    # bf16 MXU operands with f32 accumulation -> small drift vs f32 reference.
    assert jnp.allclose(out, ref, rtol=5e-2, atol=5e-2), "mismatch vs JAX reference"

    print("KERNEL_OK")
</pallas_src>

<mosaic_0001>
module attributes {stable_mosaic.version = 11 : i64} {
  func.func @_selective_gcn_kernel(%arg0: i32, %arg1: memref<256x128xbf16, #tpu.memory_space<vmem>>, %arg2: memref<128x128xbf16, #tpu.memory_space<vmem>>, %arg3: memref<2x128x1xf32, #tpu.memory_space<vmem>>, %arg4: memref<128x128xbf16, #tpu.memory_space<vmem>>, %arg5: memref<1x128xf32, #tpu.memory_space<vmem>>, %arg6: memref<128x128xbf16, #tpu.memory_space<vmem>>, %arg7: memref<1x128xf32, #tpu.memory_space<vmem>>, %arg8: memref<128x128xbf16, #tpu.memory_space<vmem>>, %arg9: memref<1x128xf32, #tpu.memory_space<vmem>>, %arg10: memref<128x128xf32, #tpu.memory_space<vmem>>, %arg11: memref<256x128xbf16, #tpu.memory_space<vmem>>) attributes {dimension_semantics = [#tpu.dimension_semantics<arbitrary>], iteration_bounds = array<i64: 1>, scalar_prefetch = 0 : i64, scratch_operands = 1 : i64, tpu.core_type = #tpu.core_type<tc>, window_params = [{pipeline_mode = #tpu.pipeline_mode<synchronous>, transform_indices = @transform_0, window_bounds = array<i64: 256, 128>}, {pipeline_mode = #tpu.pipeline_mode<synchronous>, transform_indices = @transform_1, window_bounds = array<i64: 128, 128>}, {pipeline_mode = #tpu.pipeline_mode<synchronous>, transform_indices = @transform_2, window_bounds = array<i64: 2, 128, 1>}, {pipeline_mode = #tpu.pipeline_mode<synchronous>, transform_indices = @transform_3, window_bounds = array<i64: 128, 128>}, {pipeline_mode = #tpu.pipeline_mode<synchronous>, transform_indices = @transform_4, window_bounds = array<i64: 1, 128>}, {pipeline_mode = #tpu.pipeline_mode<synchronous>, transform_indices = @transform_5, window_bounds = array<i64: 128, 128>}, {pipeline_mode = #tpu.pipeline_mode<synchronous>, transform_indices = @transform_6, window_bounds = array<i64: 1, 128>}, {pipeline_mode = #tpu.pipeline_mode<synchronous>, transform_indices = @transform_7, window_bounds = array<i64: 128, 128>}, {pipeline_mode = #tpu.pipeline_mode<synchronous>, transform_indices = @transform_8, window_bounds = array<i64: 1, 128>}, {pipeline_mode = #tpu.pipeline_mode<synchronous>, transform_indices = @transform_9, window_bounds = array<i64: 128, 128>}]} {
    %c0 = arith.constant 0 : index
    %c0_0 = arith.constant 0 : index
    %0 = vector.load %arg5[%c0, %c0_0] : memref<1x128xf32, #tpu.memory_space<vmem>>, vector<1x128xf32>
    %c0_1 = arith.constant 0 : index
    %c0_2 = arith.constant 0 : index
    %1 = vector.load %arg7[%c0_1, %c0_2] : memref<1x128xf32, #tpu.memory_space<vmem>>, vector<1x128xf32>
    %c0_3 = arith.constant 0 : index
    %c0_4 = arith.constant 0 : index
    %2 = vector.load %arg9[%c0_3, %c0_4] : memref<1x128xf32, #tpu.memory_space<vmem>>, vector<1x128xf32>
    %c0_5 = arith.constant 0 : index
    %c0_6 = arith.constant 0 : index
    %3 = vector.load %arg2[%c0_5, %c0_6] : memref<128x128xbf16, #tpu.memory_space<vmem>>, vector<128x128xbf16>
    %c0_7 = arith.constant 0 : index
    %c0_8 = arith.constant 0 : index
    %4 = vector.load %arg4[%c0_7, %c0_8] : memref<128x128xbf16, #tpu.memory_space<vmem>>, vector<128x128xbf16>
    %cst = arith.constant dense<0.000000e+00> : vector<128x128xf32>
    %5 = tpu.matmul %3, %4, %cst {dimension_numbers = #tpu.dot_dimension_numbers<[1], [0], [0], [1], [0, 0, 1, 1], [], []>} : vector<128x128xbf16>, vector<128x128xbf16>, vector<128x128xf32> -> vector<128x128xf32>
    %6 = arith.truncf %5 : vector<128x128xf32> to vector<128x128xbf16>
    %c0_9 = arith.constant 0 : index
    %c0_10 = arith.constant 0 : index
    %7 = vector.load %arg1[%c0_9, %c0_10] : memref<256x128xbf16, #tpu.memory_space<vmem>>, vector<256x128xbf16>
    %cst_11 = arith.constant dense<0.000000e+00> : vector<256x128xf32>
    %8 = tpu.matmul %7, %6, %cst_11 {dimension_numbers = #tpu.dot_dimension_numbers<[1], [0], [0], [1], [0, 0, 1, 1], [], []>} : vector<256x128xbf16>, vector<128x128xbf16>, vector<256x128xf32> -> vector<256x128xf32>
    %9 = vector.broadcast %0 : vector<1x128xf32> to vector<256x128xf32>
    %10 = arith.addf %8, %9 : vector<256x128xf32>
    %cst_12 = arith.constant 0.000000e+00 : f32
    %11 = vector.broadcast %cst_12 : f32 to vector<256x128xf32>
    %12 = arith.maximumf %10, %11 : vector<256x128xf32>
    %13 = arith.truncf %12 : vector<256x128xf32> to vector<256x128xbf16>
    %c0_13 = arith.constant 0 : index
    %c0_14 = arith.constant 0 : index
    %14 = vector.load %arg6[%c0_13, %c0_14] : memref<128x128xbf16, #tpu.memory_space<vmem>>, vector<128x128xbf16>
    %cst_15 = arith.constant dense<0.000000e+00> : vector<256x128xf32>
    %15 = tpu.matmul %13, %14, %cst_15 {dimension_numbers = #tpu.dot_dimension_numbers<[1], [0], [0], [1], [0, 0, 1, 1], [], []>} : vector<256x128xbf16>, vector<128x128xbf16>, vector<256x128xf32> -> vector<256x128xf32>
    %16 = arith.truncf %15 : vector<256x128xf32> to vector<256x128xbf16>
    %c0_16 = arith.constant 0 : index
    %c0_17 = arith.constant 0 : index
    %17 = vector.load %arg1[%c0_16, %c0_17] : memref<256x128xbf16, #tpu.memory_space<vmem>>, vector<128x128xbf16>
    %18 = vector.extract_strided_slice %16 {offsets = [0, 0], sizes = [128, 128], strides = [1, 1]} : vector<256x128xbf16> to vector<128x128xbf16>
    %cst_18 = arith.constant dense<0.000000e+00> : vector<128x128xf32>
    %19 = tpu.matmul %17, %18, %cst_18 {dimension_numbers = #tpu.dot_dimension_numbers<[1], [0], [0], [1], [0, 0, 1, 1], [], []>} : vector<128x128xbf16>, vector<128x128xbf16>, vector<128x128xf32> -> vector<128x128xf32>
    %20 = vector.broadcast %1 : vector<1x128xf32> to vector<128x128xf32>
    %21 = arith.addf %19, %20 : vector<128x128xf32>
    %cst_19 = arith.constant 0.000000e+00 : f32
    %22 = vector.broadcast %cst_19 : f32 to vector<128x128xf32>
    %23 = arith.maximumf %21, %22 : vector<128x128xf32>
    %24 = arith.truncf %23 : vector<128x128xf32> to vector<128x128xbf16>
    %c0_20 = arith.constant 0 : index
    %c0_21 = arith.constant 0 : index
    %25 = vector.load %arg11[%c0_20, %c0_21] : memref<256x128xbf16, #tpu.memory_space<vmem>>, vector<128x128xbf16>
    tpu.vector_store %arg11[%c0_20, %c0_21], %24 {strides = array<i32>} : memref<256x128xbf16, #tpu.memory_space<vmem>>, vector<128x128xbf16>,
    %c128 = arith.constant 128 : index
    %c0_22 = arith.constant 0 : index
    %26 = vector.load %arg1[%c128, %c0_22] : memref<256x128xbf16, #tpu.memory_space<vmem>>, vector<128x128xbf16>
    %27 = vector.extract_strided_slice %16 {offsets = [128, 0], sizes = [128, 128], strides = [1, 1]} : vector<256x128xbf16> to vector<128x128xbf16>
    %cst_23 = arith.constant dense<0.000000e+00> : vector<128x128xf32>
    %28 = tpu.matmul %26, %27, %cst_23 {dimension_numbers = #tpu.dot_dimension_numbers<[1], [0], [0], [1], [0, 0, 1, 1], [], []>} : vector<128x128xbf16>, vector<128x128xbf16>, vector<128x128xf32> -> vector<128x128xf32>
    %29 = vector.broadcast %1 : vector<1x128xf32> to vector<128x128xf32>
    %30 = arith.addf %28, %29 : vector<128x128xf32>
    %cst_24 = arith.constant 0.000000e+00 : f32
    %31 = vector.broadcast %cst_24 : f32 to vector<128x128xf32>
    %32 = arith.maximumf %30, %31 : vector<128x128xf32>
    %33 = arith.truncf %32 : vector<128x128xf32> to vector<128x128xbf16>
    %c128_25 = arith.constant 128 : index
    %c0_26 = arith.constant 0 : index
    %34 = vector.load %arg11[%c128_25, %c0_26] : memref<256x128xbf16, #tpu.memory_space<vmem>>, vector<128x128xbf16>
    tpu.vector_store %arg11[%c128_25, %c0_26], %33 {strides = array<i32>} : memref<256x128xbf16, #tpu.memory_space<vmem>>, vector<128x128xbf16>,
    %c0_27 = arith.constant 0 : index
    %c0_28 = arith.constant 0 : index
    %35 = vector.load %arg11[%c0_27, %c0_28] : memref<256x128xbf16, #tpu.memory_space<vmem>>, vector<256x128xbf16>
    %c0_29 = arith.constant 0 : index
    %c0_30 = arith.constant 0 : index
    %36 = vector.load %arg8[%c0_29, %c0_30] : memref<128x128xbf16, #tpu.memory_space<vmem>>, vector<128x128xbf16>
    %cst_31 = arith.constant dense<0.000000e+00> : vector<256x128xf32>
    %37 = tpu.matmul %35, %36, %cst_31 {dimension_numbers = #tpu.dot_dimension_numbers<[1], [0], [0], [1], [0, 0, 1, 1], [], []>} : vector<256x128xbf16>, vector<128x128xbf16>, vector<256x128xf32> -> vector<256x128xf32>
    %38 = arith.truncf %37 : vector<256x128xf32> to vector<256x128xbf16>
    %cst_32 = arith.constant 0.000000e+00 : f32
    %39 = vector.broadcast %cst_32 : f32 to vector<128x128xf32>
    %c0_33 = arith.constant 0 : index
    %c0_34 = arith.constant 0 : index
    %40 = vector.load %arg10[%c0_33, %c0_34] : memref<128x128xf32, #tpu.memory_space<vmem>>, vector<128x128xf32>
    tpu.vector_store %arg10[%c0_33, %c0_34], %39 {strides = array<i32>} : memref<128x128xf32, #tpu.memory_space<vmem>>, vector<128x128xf32>,
    %c0_35 = arith.constant 0 : index
    %c0_36 = arith.constant 0 : index
    %41 = vector.load %arg1[%c0_35, %c0_36] : memref<256x128xbf16, #tpu.memory_space<vmem>>, vector<128x128xbf16>
    %42 = vector.extract_strided_slice %38 {offsets = [0, 0], sizes = [128, 128], strides = [1, 1]} : vector<256x128xbf16> to vector<128x128xbf16>
    %cst_37 = arith.constant dense<0.000000e+00> : vector<128x128xf32>
    %43 = tpu.matmul %41, %42, %cst_37 {dimension_numbers = #tpu.dot_dimension_numbers<[1], [0], [0], [1], [0, 0, 1, 1], [], []>} : vector<128x128xbf16>, vector<128x128xbf16>, vector<128x128xf32> -> vector<128x128xf32>
    %44 = vector.broadcast %2 : vector<1x128xf32> to vector<128x128xf32>
    %45 = arith.addf %43, %44 : vector<128x128xf32>
    %c0_38 = arith.constant 0 : index
    %c0_39 = arith.constant 0 : index
    %46 = vector.load %arg10[%c0_38, %c0_39] : memref<128x128xf32, #tpu.memory_space<vmem>>, vector<128x128xf32>
    %c0_40 = arith.constant 0 : index
    %c0_41 = arith.constant 0 : index
    %c0_42 = arith.constant 0 : index
    %47 = vector.load %arg3[%c0_40, %c0_41, %c0_42] : memref<2x128x1xf32, #tpu.memory_space<vmem>>, vector<1x128x1xf32>
    %48 = vector.shape_cast %47 : vector<1x128x1xf32> to vector<128x1xf32>
    %49 = vector.broadcast %48 : vector<128x1xf32> to vector<128x128xf32>
    %50 = arith.mulf %49, %45 : vector<128x128xf32>
    %51 = arith.addf %46, %50 : vector<128x128xf32>
    %c0_43 = arith.constant 0 : index
    %c0_44 = arith.constant 0 : index
    %52 = vector.load %arg10[%c0_43, %c0_44] : memref<128x128xf32, #tpu.memory_space<vmem>>, vector<128x128xf32>
    tpu.vector_store %arg10[%c0_43, %c0_44], %51 {strides = array<i32>} : memref<128x128xf32, #tpu.memory_space<vmem>>, vector<128x128xf32>,
    %c128_45 = arith.constant 128 : index
    %c0_46 = arith.constant 0 : index
    %53 = vector.load %arg1[%c128_45, %c0_46] : memref<256x128xbf16, #tpu.memory_space<vmem>>, vector<128x128xbf16>
    %54 = vector.extract_strided_slice %38 {offsets = [128, 0], sizes = [128, 128], strides = [1, 1]} : vector<256x128xbf16> to vector<128x128xbf16>
    %cst_47 = arith.constant dense<0.000000e+00> : vector<128x128xf32>
    %55 = tpu.matmul %53, %54, %cst_47 {dimension_numbers = #tpu.dot_dimension_numbers<[1], [0], [0], [1], [0, 0, 1, 1], [], []>} : vector<128x128xbf16>, vector<128x128xbf16>, vector<128x128xf32> -> vector<128x128xf32>
    %56 = vector.broadcast %2 : vector<1x128xf32> to vector<128x128xf32>
    %57 = arith.addf %55, %56 : vector<128x128xf32>
    %c0_48 = arith.constant 0 : index
    %c0_49 = arith.constant 0 : index
    %58 = vector.load %arg10[%c0_48, %c0_49] : memref<128x128xf32, #tpu.memory_space<vmem>>, vector<128x128xf32>
    %c1 = arith.constant 1 : index
    %c0_50 = arith.constant 0 : index
    %c0_51 = arith.constant 0 : index
    %59 = vector.load %arg3[%c1, %c0_50, %c0_51] : memref<2x128x1xf32, #tpu.memory_space<vmem>>, vector<1x128x1xf32>
    %60 = vector.shape_cast %59 : vector<1x128x1xf32> to vector<128x1xf32>
    %61 = vector.broadcast %60 : vector<128x1xf32> to vector<128x128xf32>
    %62 = arith.mulf %61, %57 : vector<128x128xf32>
    %63 = arith.addf %58, %62 : vector<128x128xf32>
    %c0_52 = arith.constant 0 : index
    %c0_53 = arith.constant 0 : index
    %64 = vector.load %arg10[%c0_52, %c0_53] : memref<128x128xf32, #tpu.memory_space<vmem>>, vector<128x128xf32>
    tpu.vector_store %arg10[%c0_52, %c0_53], %63 {strides = array<i32>} : memref<128x128xf32, #tpu.memory_space<vmem>>, vector<128x128xf32>,
    return
  }
  func.func @transform_0(%arg0: i32) -> (i32, i32) {
    %c0_i32 = arith.constant 0 : i32
    %c0_i32_0 = arith.constant 0 : i32
    %c0_i32_1 = arith.constant 0 : i32
    return %c0_i32, %c0_i32_0 : i32, i32
  }
  func.func @transform_1(%arg0: i32) -> (i32, i32) {
    %c0_i32 = arith.constant 0 : i32
    %c0_i32_0 = arith.constant 0 : i32
    %c0_i32_1 = arith.constant 0 : i32
    return %c0_i32, %c0_i32_0 : i32, i32
  }
  func.func @transform_2(%arg0: i32) -> (i32, i32, i32) {
    %c0_i32 = arith.constant 0 : i32
    %c0_i32_0 = arith.constant 0 : i32
    %c0_i32_1 = arith.constant 0 : i32
    %c0_i32_2 = arith.constant 0 : i32
    return %c0_i32, %c0_i32_0, %c0_i32_1 : i32, i32, i32
  }
  func.func @transform_3(%arg0: i32) -> (i32, i32) {
    %c0_i32 = arith.constant 0 : i32
    %c0_i32_0 = arith.constant 0 : i32
    %c0_i32_1 = arith.constant 0 : i32
    return %c0_i32, %c0_i32_0 : i32, i32
  }
  func.func @transform_4(%arg0: i32) -> (i32, i32) {
    %c0_i32 = arith.constant 0 : i32
    %c0_i32_0 = arith.constant 0 : i32
    %c0_i32_1 = arith.constant 0 : i32
    return %c0_i32, %c0_i32_0 : i32, i32
  }
  func.func @transform_5(%arg0: i32) -> (i32, i32) {
    %c0_i32 = arith.constant 0 : i32
    %c0_i32_0 = arith.constant 0 : i32
    %c0_i32_1 = arith.constant 0 : i32
    return %c0_i32, %c0_i32_0 : i32, i32
  }
  func.func @transform_6(%arg0: i32) -> (i32, i32) {
    %c0_i32 = arith.constant 0 : i32
    %c0_i32_0 = arith.constant 0 : i32
    %c0_i32_1 = arith.constant 0 : i32
    return %c0_i32, %c0_i32_0 : i32, i32
  }
  func.func @transform_7(%arg0: i32) -> (i32, i32) {
    %c0_i32 = arith.constant 0 : i32
    %c0_i32_0 = arith.constant 0 : i32
    %c0_i32_1 = arith.constant 0 : i32
    return %c0_i32, %c0_i32_0 : i32, i32
  }
  func.func @transform_8(%arg0: i32) -> (i32, i32) {
    %c0_i32 = arith.constant 0 : i32
    %c0_i32_0 = arith.constant 0 : i32
    %c0_i32_1 = arith.constant 0 : i32
    return %c0_i32, %c0_i32_0 : i32, i32
  }
  func.func @transform_9(%arg0: i32) -> (i32, i32) {
    %c0_i32 = arith.constant 0 : i32
    %c0_i32_0 = arith.constant 0 : i32
    %c0_i32_1 = arith.constant 0 : i32
    return %c0_i32, %c0_i32_0 : i32, i32
  }
}

</mosaic_0001>

<bundles_post_ra>
// kernel: tpu_custom_call.1
= control target key start
LH: loop header
LB: loop body
LE: loop exit
PB: predicated region body
PF: predicated region fallthrough
CT: control target
= control target key end

     0   :  { %14 = vsyncpa [#allocation4], 0  ;;  %s3914_s0 = inlined_call_operand.vmem [shape: bf16[256,128], index: 0, kind: input, shape index: {}]   ;;  %s3915_s1 = inlined_call_operand.vmem [shape: bf16[128,128], index: 1, kind: input, shape index: {}]   ;;  %s3916_s2 = inlined_call_operand.vmem [shape: f32[2,128,1], index: 2, kind: input, shape index: {}]   ;;  %s3917_s3 = inlined_call_operand.vmem [shape: bf16[128,128], index: 3, kind: input, shape index: {}]   ;;  %s3918_s4 = inlined_call_operand.vmem [shape: f32[1,128], index: 4, kind: input, shape index: {}]   ;;  %s3919_s5 = inlined_call_operand.hbm [shape: bf16[128,128], index: 5, kind: input, shape index: {}]   ;;  %s3920_s6 = inlined_call_operand.vmem [shape: f32[1,128], index: 6, kind: input, shape index: {}]   ;;  %s3921_s7 = inlined_call_operand.hbm [shape: bf16[128,128], index: 7, kind: input, shape index: {}]   ;;  %s3922_s8 = inlined_call_operand.vmem [shape: f32[1,128], index: 8, kind: input, shape index: {}]   ;;  %s3923_s9 = inlined_call_operand.hbm [shape: f32[128,128], index: 9, kind: output, shape index: {}]  }
   0x1   :  { %15 = vsyncpa [#allocation7], 0 }
   0x2   :  { %16 = vsyncpa [#allocation5], 0  ;;  %s3373_s30 = smov [#allocation3]  }
   0x3   :  { %s32_s10 = sshll.u32 %s3373_s30, 4  ;;  %s33_s10 = int_to_ptr.vmem [resolvable:$true] %s32_s10 }
   0x4   :  { %s3315_s11 = scalar_lea.vmem %s33_s10, 1024  ;;  %p3320_p1 = scmp.lt.s32.totalorder %s33_s10, %s33_s10 }
   0x5   :  { %p3316_p0 = scmp.ne.s32.totalorder %s33_s10, %s3315_s11  ;;  %p3321_p2 = scmp.lt.s32.totalorder %s3315_s11, %s3315_s11 }
   0x7   :  { %p3322_p3 = por %p3321_p2, %p3320_p1 }
   0x9   :  { %p3323_p4 = pnand %p3322_p3, %p3316_p0 }
   0xb   :  { %3326 = shalt.err (!%p3323_p4)
}
   0xc   :  { %s3374_s12 = smov 64   ;;  %s3375_s13 = smov 4  }
   0xd   :  { %38 = dma.hbm_to_vmem [thread:$0]  %s3919_s5, 1024, %s33_s10, [#allocation4], %s3374_s12, %s3374_s12, %s3375_s13  }
   0xe   :  { %s3376_s16 = smov [#allocation6]  }
   0xf   :  { %s46_s17 = sshll.u32 %s3376_s16, 4  ;;  %s47_s17 = int_to_ptr.vmem [resolvable:$true] %s46_s17 }
  0x10   :  { %s3335_s18 = scalar_lea.vmem %s47_s17, 1024  ;;  %p3340_p6 = scmp.lt.s32.totalorder %s47_s17, %s47_s17 }
  0x11   :  { %p3336_p5 = scmp.ne.s32.totalorder %s47_s17, %s3335_s18  ;;  %p3341_p7 = scmp.lt.s32.totalorder %s3335_s18, %s3335_s18 }
  0x13   :  { %p3342_p8 = por %p3341_p7, %p3340_p6 }
  0x15   :  { %p3343_p9 = pnand %p3342_p8, %p3336_p5 }
  0x17   :  { %3346 = shalt.err (!%p3343_p9)
}
  0x18   :  { %52 = dma.hbm_to_vmem [thread:$0]  %s3921_s7, 1024, %s47_s17, [#allocation7], %s3374_s12, %s3374_s12, %s3375_s13  }
  0x19   :  { %3367 = dma.done.wait [#allocation4], 1024  }
  0x1a   :  { %3368 = vsyncadd [#allocation4], 4294966272 }
  0x1b   :  { %3369 = dma.done.wait [#allocation7], 1024  }
  0x1c   :  { %3370 = vsyncadd [#allocation7], 4294966272  ;;  %v3211_v0 = vld [vmem:[%s3917_s3 + $0x38] sm:$0xff]   ;;  %v3212_v1 = vld [vmem:[%s3917_s3 + $0x30] sm:$0xff]  }
  0x1d   :  { %2880 = vmatprep.subr.bf16.mxu0 %v3211_v0  ;;  %v3213_v2 = vld [vmem:[%s3917_s3 + $0x28] sm:$0xff]   ;;  %v3214_v3 = vld [vmem:[%s3917_s3 + $0x20] sm:$0xff]   ;;  %v3215_v5 = vld [vmem:[%s3917_s3 + $0x18] sm:$0xff]  }
  0x1e   :  { %2881 = vmatpush3.bf16.msra.mxu0 %v3211_v0  ;;  %v3219_v4 = vld [vmem:[%s3915_s1] sm:$0xff]   ;;  %v3216_v6 = vld [vmem:[%s3917_s3 + $0x10] sm:$0xff]   ;;  %v3217_v7 = vld [vmem:[%s3917_s3 + $0x8] sm:$0xff]  }
  0x1f   :  { %2882 = vmatprep.subr.bf16.mxu0 %v3212_v1  ;;  %2896 = vmatprep.mubr.bf16.mxu0 %v3219_v4  ;;  %v3218_v8 = vld [vmem:[%s3917_s3] sm:$0xff]   ;;  %v3220_v9 = vld [vmem:[%s3915_s1 + $0x8] sm:$0xff]   ;;  %v3221_v10 = vld [vmem:[%s3915_s1 + $0x10] sm:$0xff]  }
  0x20   :  { %v3222_v11 = vld [vmem:[%s3915_s1 + $0x18] sm:$0xff]   ;;  %v3223_v12 = vld [vmem:[%s3915_s1 + $0x20] sm:$0xff]   ;;  %v3224_v13 = vld [vmem:[%s3915_s1 + $0x28] sm:$0xff]  }
  0x21   :  { %v3225_v14 = vld [vmem:[%s3915_s1 + $0x30] sm:$0xff]   ;;  %v3226_v15 = vld [vmem:[%s3915_s1 + $0x38] sm:$0xff]   ;;  %v3227_v16 = vld [vmem:[%s3914_s0] sm:$0xff]  }
  0x22   :  { %2883 = vmatpush3.bf16.msra.mxu0 %v3212_v1  ;;  %2928 = vmatprep.mubr.bf16.mxu1 %v3227_v16  ;;  %v3243_v17 = vld [vmem:[#allocation3 + $0x38] sm:$0xff]   ;;  %v3244_v18 = vld [vmem:[#allocation3 + $0x30] sm:$0xff]   ;;  %v3245_v19 = vld [vmem:[#allocation3 + $0x28] sm:$0xff]  }
  0x23   :  { %2884 = vmatprep.subr.bf16.mxu0 %v3213_v2  ;;  %v3246_v20 = vld [vmem:[#allocation3 + $0x20] sm:$0xff]   ;;  %v3247_v23 = vld [vmem:[#allocation3 + $0x18] sm:$0xff]   ;;  %v3228_v46 = vld [vmem:[%s3914_s0 + $0x8] sm:$0xff]  }
  0x24   :  { %v3229_v47 = vld [vmem:[%s3914_s0 + $0x10] sm:$0xff]   ;;  %v3230_v48 = vld [vmem:[%s3914_s0 + $0x18] sm:$0xff]   ;;  %v3231_v49 = vld [vmem:[%s3914_s0 + $0x20] sm:$0xff]  }
  0x25   :  { %v3232_v50 = vld [vmem:[%s3914_s0 + $0x28] sm:$0xff]   ;;  %v3233_v51 = vld [vmem:[%s3914_s0 + $0x30] sm:$0xff]   ;;  %v3234_v52 = vld [vmem:[%s3914_s0 + $0x38] sm:$0xff]  }
  0x26   :  { %2885 = vmatpush3.bf16.msra.mxu0 %v3213_v2  ;;  %v3235_v53 = vld [vmem:[%s3914_s0 + $0x40] sm:$0xff]   ;;  %v3236_v54 = vld [vmem:[%s3914_s0 + $0x48] sm:$0xff]   ;;  %v3237_v55 = vld [vmem:[%s3914_s0 + $0x50] sm:$0xff]  }
  0x27   :  { %2886 = vmatprep.subr.bf16.mxu0 %v3214_v3  ;;  %v3238_v56 = vld [vmem:[%s3914_s0 + $0x58] sm:$0xff]   ;;  %v3239_v57 = vld [vmem:[%s3914_s0 + $0x60] sm:$0xff]   ;;  %v3240_v58 = vld [vmem:[%s3914_s0 + $0x68] sm:$0xff]  }
  0x28   :  { %v3241_v59 = vld [vmem:[%s3914_s0 + $0x70] sm:$0xff]   ;;  %v3242_v60 = vld [vmem:[%s3914_s0 + $0x78] sm:$0xff]   ;;  %v3249_v62 = vld [vmem:[#allocation3 + $0x8] sm:$0xff]  }
  0x29   :  { %v3248_v61 = vld [vmem:[#allocation3 + $0x10] sm:$0xff]   ;;  %v3250_v63 = vld [vmem:[#allocation3] sm:$0xff]  }
  0x2a   :  { %2887 = vmatpush3.bf16.msra.mxu0 %v3214_v3  ;;  %v3536_v2 = vld [vmem:[%s3918_s4] ss:$0 sm:$0xff] }
  0x2b   :  { %2888 = vmatprep.subr.bf16.mxu0 %v3215_v5 }
  0x2e   :  { %2889 = vmatpush3.bf16.msra.mxu0 %v3215_v5 }
  0x2f   :  { %2890 = vmatprep.subr.bf16.mxu0 %v3216_v6 }
  0x32   :  { %2891 = vmatpush3.bf16.msra.mxu0 %v3216_v6 }
  0x33   :  { %2892 = vmatprep.subr.bf16.mxu0 %v3217_v7 }
  0x36   :  { %2893 = vmatpush3.bf16.msra.mxu0 %v3217_v7 }
  0x37   :  { %2894 = vmatprep.subr.bf16.mxu0 %v3218_v8 }
  0x3a   :  { %2895 = vmatpush3.bf16.msra.mxu0 %v3218_v8 }
  0x3b   :  { %2960 = vmatprep.subr.bf16.mxu0 %v3243_v17 }
  0x3d   :  { %2897 = vmatmul.mubr.bf16.vlgmr.msra.gmra.mxu0 %v3220_v9 }
  0x3e   :  { %2900 = vmatprep.mubr.bf16.mxu0 %v3221_v10  ;;  %2961 = vmatpush3.bf16.msra.mxu0 %v3243_v17 }
  0x3f   :  { %2962 = vmatprep.subr.bf16.mxu0 %v3244_v18 }
  0x42   :  { %2963 = vmatpush3.bf16.msra.mxu0 %v3244_v18 }
  0x43   :  { %2964 = vmatprep.subr.bf16.mxu0 %v3245_v19 }
  0x45   :  { %2901 = vmatmul.mubr.bf16.gmra.mxu0 %v3222_v11 }
  0x46   :  { %2904 = vmatprep.mubr.bf16.mxu0 %v3223_v12  ;;  %2965 = vmatpush3.bf16.msra.mxu0 %v3245_v19 }
  0x47   :  { %2966 = vmatprep.subr.bf16.mxu0 %v3246_v20 }
  0x4a   :  { %2967 = vmatpush3.bf16.msra.mxu0 %v3246_v20 }
  0x4b   :  { %2968 = vmatprep.subr.bf16.mxu0 %v3247_v23 }
  0x4d   :  { %2905 = vmatmul.mubr.bf16.gmra.mxu0 %v3224_v13 }
  0x4e   :  { %2908 = vmatprep.mubr.bf16.mxu0 %v3225_v14  ;;  %2969 = vmatpush3.bf16.msra.mxu0 %v3247_v23 }
  0x4f   :  { %2970 = vmatprep.subr.bf16.mxu0 %v3248_v61 }
  0x52   :  { %2971 = vmatpush3.bf16.msra.mxu0 %v3248_v61 }
  0x53   :  { %2972 = vmatprep.subr.bf16.mxu0 %v3249_v62 }
  0x55   :  { %2909 = vmatmul.mubr.bf16.gmra.mxu0 %v3226_v15 }
  0x56   :  { %2973 = vmatpush3.bf16.msra.mxu0 %v3249_v62 }
  0x57   :  { %2974 = vmatprep.subr.bf16.mxu0 %v3250_v63 }
  0x5a   :  { %2975 = vmatpush3.bf16.msra.mxu0 %v3250_v63 }
  0xfd   :  { %v2898_v21 = vpop.f32.mrf.mxu0 }
  0xff   :  { %v227_v22 = vpop.f32.mrf.mxu0 }
 0x101   :  { %v2899_v24 = vpop.f32.mrf.mxu0 }
 0x102   :  { %v291_v44 = vpack.c.bf16 %v2899_v24, %v2898_v21 }
 0x103   :  { %v230_v25 = vpop.f32.mrf.mxu0 }
 0x104   :  { %v290_v45 = vpack.c.bf16 %v230_v25, %v227_v22 }
 0x105   :  { %v2902_v26 = vpop.f32.mrf.mxu0 }
 0x107   :  { %v243_v27 = vpop.f32.mrf.mxu0 }
 0x109   :  { %v2903_v28 = vpop.f32.mrf.mxu0 }
 0x10a   :  { %v293_v42 = vpack.c.bf16 %v2903_v28, %v2902_v26 }
 0x10b   :  { %v246_v29 = vpop.f32.mrf.mxu0 }
 0x10c   :  { %v292_v43 = vpack.c.bf16 %v246_v29, %v243_v27 }
 0x10d   :  { %v2906_v30 = vpop.f32.mrf.mxu0 }
 0x10f   :  { %v259_v31 = vpop.f32.mrf.mxu0 }
 0x111   :  { %v2907_v32 = vpop.f32.mrf.mxu0 }
 0x112   :  { %v295_v40 = vpack.c.bf16 %v2907_v32, %v2906_v30 }
 0x113   :  { %v262_v33 = vpop.f32.mrf.mxu0 }
 0x114   :  { %v294_v41 = vpack.c.bf16 %v262_v33, %v259_v31 }
 0x115   :  { %v2910_v34 = vpop.f32.mrf.mxu0 }
 0x117   :  { %v275_v35 = vpop.f32.mrf.mxu0 }
 0x119   :  { %v2911_v36 = vpop.f32.mrf.mxu0 }
 0x11a   :  { %v297_v37 = vpack.c.bf16 %v2911_v36, %v2910_v34 }
 0x11b   :  { %v278_v38 = vpop.f32.mrf.mxu0 }
 0x11c   :  { %v296_v39 = vpack.c.bf16 %v278_v38, %v275_v35  ;;  %2912 = vmatprep.subr.bf16.mxu1 %v297_v37 }
 0x11d   :  { %2913 = vmatpush3.bf16.msra.mxu1 %v297_v37 }
 0x11e   :  { %2914 = vmatprep.subr.bf16.mxu1 %v296_v39 }
 0x121   :  { %2915 = vmatpush3.bf16.msra.mxu1 %v296_v39 }
 0x122   :  { %2916 = vmatprep.subr.bf16.mxu1 %v295_v40 }
 0x125   :  { %2917 = vmatpush3.bf16.msra.mxu1 %v295_v40 }
 0x126   :  { %2918 = vmatprep.subr.bf16.mxu1 %v294_v41 }
 0x129   :  { %2919 = vmatpush3.bf16.msra.mxu1 %v294_v41 }
 0x12a   :  { %2920 = vmatprep.subr.bf16.mxu1 %v293_v42 }
 0x12d   :  { %2921 = vmatpush3.bf16.msra.mxu1 %v293_v42 }
 0x12e   :  { %2922 = vmatprep.subr.bf16.mxu1 %v292_v43 }
 0x131   :  { %2923 = vmatpush3.bf16.msra.mxu1 %v292_v43 }
 0x132   :  { %2924 = vmatprep.subr.bf16.mxu1 %v291_v44 }
 0x135   :  { %2925 = vmatpush3.bf16.msra.mxu1 %v291_v44 }
 0x136   :  { %2926 = vmatprep.subr.bf16.mxu1 %v290_v45 }
 0x139   :  { %2927 = vmatpush3.bf16.msra.mxu1 %v290_v45 }
 0x13c   :  { %2929 = vmatmul.mubr.bf16.vlgmr.msra.gmra.mxu1 %v3228_v46 }
 0x13d   :  { %2932 = vmatprep.mubr.bf16.mxu1 %v3229_v47 }
 0x144   :  { %2933 = vmatmul.mubr.bf16.gmra.mxu1 %v3230_v48 }
 0x145   :  { %2936 = vmatprep.mubr.bf16.mxu1 %v3231_v49 }
 0x14c   :  { %2937 = vmatmul.mubr.bf16.gmra.mxu1 %v3232_v50 }
 0x14d   :  { %2940 = vmatprep.mubr.bf16.mxu1 %v3233_v51 }
 0x154   :  { %2941 = vmatmul.mubr.bf16.gmra.mxu1 %v3234_v52 }
 0x155   :  { %2944 = vmatprep.mubr.bf16.mxu1 %v3235_v53 }
 0x15c   :  { %2945 = vmatmul.mubr.bf16.gmra.mxu1 %v3236_v54 }
 0x15d   :  { %2948 = vmatprep.mubr.bf16.mxu1 %v3237_v55 }
 0x164   :  { %2949 = vmatmul.mubr.bf16.gmra.mxu1 %v3238_v56 }
 0x165   :  { %2952 = vmatprep.mubr.bf16.mxu1 %v3239_v57 }
 0x16c   :  { %2953 = vmatmul.mubr.bf16.gmra.mxu1 %v3240_v58 }
 0x16d   :  { %2956 = vmatprep.mubr.bf16.mxu1 %v3241_v59 }
 0x174   :  { %2957 = vmatmul.mubr.bf16.gmra.mxu1 %v3242_v60 }
 0x1fc   :  { %v2930_v0 = vpop.f32.mrf.mxu1 }
 0x1fd   :  { %v475_v6 = vadd.f32 %v2930_v0, %v3536_v2 }
 0x1fe   :  { %v466_v1 = vpop.f32.mrf.mxu1 }
 0x1ff   :  { %v467_v4 = vadd.f32 %v3536_v2, %v466_v1  ;;  %v595_v13 = vmax.f32 %v475_v6, 0.0 }
 0x200   :  { %v2931_v3 = vpop.f32.mrf.mxu1 }
 0x201   :  { %v478_v5 = vadd.f32 %v2931_v3, %v3536_v2  ;;  %v593_v11 = vmax.f32 %v467_v4, 0.0 }
 0x202   :  { %v469_v7 = vpop.f32.mrf.mxu1 }
 0x203   :  { %v470_v8 = vadd.f32 %v3536_v2, %v469_v7  ;;  %v596_v9 = vmax.f32 %v478_v5, 0.0 }
 0x204   :  { %v2934_v10 = vpop.f32.mrf.mxu1 }
 0x205   :  { %v594_v12 = vmax.f32 %v470_v8, 0.0  ;;  %v626_v16 = vpack.c.bf16 %v596_v9, %v595_v13  ;;  %v491_v20 = vadd.f32 %v2934_v10, %v3536_v2 }
 0x206   :  { %v482_v14 = vpop.f32.mrf.mxu1 }
 0x207   :  { %v625_v15 = vpack.c.bf16 %v594_v12, %v593_v11  ;;  %v483_v18 = vadd.f32 %v3536_v2, %v482_v14  ;;  %v599_v27 = vmax.f32 %v491_v20, 0.0 }
 0x208   :  { %v2935_v17 = vpop.f32.mrf.mxu1 }
 0x209   :  { %v494_v19 = vadd.f32 %v2935_v17, %v3536_v2  ;;  %2976 = vmatprep.mubr.bf16.mxu0 %v625_v15  ;;  %v597_v25 = vmax.f32 %v483_v18, 0.0 }
 0x20a   :  { %v485_v21 = vpop.f32.mrf.mxu1  ;;  %2977 = vmatmul.mubr.bf16.vlgmr.msra.gmra.mxu0 %v626_v16 }
 0x20b   :  { %v486_v22 = vadd.f32 %v3536_v2, %v485_v21  ;;  %v600_v23 = vmax.f32 %v494_v19, 0.0 }
 0x20c   :  { %v2938_v24 = vpop.f32.mrf.mxu1 }
 0x20d   :  { %v598_v26 = vmax.f32 %v486_v22, 0.0  ;;  %v628_v30 = vpack.c.bf16 %v600_v23, %v599_v27  ;;  %v507_v34 = vadd.f32 %v2938_v24, %v3536_v2 }
 0x20e   :  { %v498_v28 = vpop.f32.mrf.mxu1 }
 0x20f   :  { %v627_v29 = vpack.c.bf16 %v598_v26, %v597_v25  ;;  %v499_v32 = vadd.f32 %v3536_v2, %v498_v28  ;;  %v603_v41 = vmax.f32 %v507_v34, 0.0 }
 0x210   :  { %v2939_v31 = vpop.f32.mrf.mxu1 }
 0x211   :  { %v510_v33 = vadd.f32 %v2939_v31, %v3536_v2  ;;  %2980 = vmatprep.mubr.bf16.mxu0 %v627_v29  ;;  %v601_v39 = vmax.f32 %v499_v32, 0.0 }
 0x212   :  { %v501_v35 = vpop.f32.mrf.mxu1  ;;  %2981 = vmatmul.mubr.bf16.gmra.mxu0 %v628_v30 }
 0x213   :  { %v502_v36 = vadd.f32 %v3536_v2, %v501_v35  ;;  %v604_v37 = vmax.f32 %v510_v33, 0.0 }
 0x214   :  { %v2942_v38 = vpop.f32.mrf.mxu1 }
 0x215   :  { %v602_v40 = vmax.f32 %v502_v36, 0.0  ;;  %v630_v44 = vpack.c.bf16 %v604_v37, %v603_v41  ;;  %v523_v48 = vadd.f32 %v2942_v38, %v3536_v2 }
 0x216   :  { %v514_v42 = vpop.f32.mrf.mxu1 }
 0x217   :  { %v629_v43 = vpack.c.bf16 %v602_v40, %v601_v39  ;;  %v515_v46 = vadd.f32 %v3536_v2, %v514_v42  ;;  %v607_v55 = vmax.f32 %v523_v48, 0.0 }
 0x218   :  { %v2943_v45 = vpop.f32.mrf.mxu1 }
 0x219   :  { %v526_v47 = vadd.f32 %v2943_v45, %v3536_v2  ;;  %2984 = vmatprep.mubr.bf16.mxu0 %v629_v43  ;;  %v605_v53 = vmax.f32 %v515_v46, 0.0 }
 0x21a   :  { %v517_v49 = vpop.f32.mrf.mxu1  ;;  %2985 = vmatmul.mubr.bf16.gmra.mxu0 %v630_v44 }
 0x21b   :  { %v518_v50 = vadd.f32 %v3536_v2, %v517_v49  ;;  %v608_v51 = vmax.f32 %v526_v47, 0.0 }
 0x21c   :  { %v2946_v52 = vpop.f32.mrf.mxu1 }
 0x21d   :  { %v606_v54 = vmax.f32 %v518_v50, 0.0  ;;  %v632_v58 = vpack.c.bf16 %v608_v51, %v607_v55  ;;  %v539_v62 = vadd.f32 %v2946_v52, %v3536_v2  ;;  %v3251_v50 = vld [vmem:[%s3914_s0] sm:$0xff]  }
 0x21e   :  { %v530_v56 = vpop.f32.mrf.mxu1  ;;  %3024 = vmatprep.mubr.bf16.mxu1 %v3251_v50  ;;  %v3259_v51 = vld [vmem:[%s3914_s0 + $0x40] sm:$0xff]   ;;  %v3265_v50 = vld [vmem:[%s3914_s0 + $0x70] sm:$0xff]  }
 0x21f   :  { %v631_v57 = vpack.c.bf16 %v606_v54, %v605_v53  ;;  %v531_v60 = vadd.f32 %v3536_v2, %v530_v56  ;;  %v611_v6 = vmax.f32 %v539_v62, 0.0 }
 0x220   :  { %v2947_v59 = vpop.f32.mrf.mxu1 }
 0x221   :  { %v542_v61 = vadd.f32 %v2947_v59, %v3536_v2  ;;  %2988 = vmatprep.mubr.bf16.mxu0 %v631_v57  ;;  %v609_v4 = vmax.f32 %v531_v60, 0.0 }
 0x222   :  { %v533_v63 = vpop.f32.mrf.mxu1  ;;  %2989 = vmatmul.mubr.bf16.gmra.mxu0 %v632_v58 }
 0x223   :  { %v534_v0 = vadd.f32 %v3536_v2, %v533_v63  ;;  %v612_v1 = vmax.f32 %v542_v61, 0.0 }
 0x224   :  { %v2950_v3 = vpop.f32.mrf.mxu1 }
 0x225   :  { %v610_v5 = vmax.f32 %v534_v0, 0.0  ;;  %v634_v9 = vpack.c.bf16 %v612_v1, %v611_v6  ;;  %v555_v13 = vadd.f32 %v2950_v3, %v3536_v2 }
 0x226   :  { %v546_v7 = vpop.f32.mrf.mxu1 }
 0x227   :  { %v633_v8 = vpack.c.bf16 %v610_v5, %v609_v4  ;;  %v547_v11 = vadd.f32 %v3536_v2, %v546_v7  ;;  %v615_v20 = vmax.f32 %v555_v13, 0.0 }
 0x228   :  { %v2951_v10 = vpop.f32.mrf.mxu1 }
 0x229   :  { %v558_v12 = vadd.f32 %v2951_v10, %v3536_v2  ;;  %2992 = vmatprep.mubr.bf16.mxu0 %v633_v8  ;;  %v613_v18 = vmax.f32 %v547_v11, 0.0 }
 0x22a   :  { %v549_v14 = vpop.f32.mrf.mxu1  ;;  %2993 = vmatmul.mubr.bf16.gmra.mxu0 %v634_v9 }
 0x22b   :  { %v550_v15 = vadd.f32 %v3536_v2, %v549_v14  ;;  %v616_v16 = vmax.f32 %v558_v12, 0.0 }
 0x22c   :  { %v2954_v17 = vpop.f32.mrf.mxu1 }
 0x22d   :  { %v614_v19 = vmax.f32 %v550_v15, 0.0  ;;  %v636_v23 = vpack.c.bf16 %v616_v16, %v615_v20  ;;  %v571_v27 = vadd.f32 %v2954_v17, %v3536_v2 }
 0x22e   :  { %v562_v21 = vpop.f32.mrf.mxu1 }
 0x22f   :  { %v635_v22 = vpack.c.bf16 %v614_v19, %v613_v18  ;;  %v563_v25 = vadd.f32 %v3536_v2, %v562_v21  ;;  %v619_v34 = vmax.f32 %v571_v27, 0.0  ;;  %v3252_v27 = vld [vmem:[%s3914_s0 + $0x8] sm:$0xff]  }
 0x230   :  { %v2955_v24 = vpop.f32.mrf.mxu1 }
 0x231   :  { %v574_v26 = vadd.f32 %v2955_v24, %v3536_v2  ;;  %2996 = vmatprep.mubr.bf16.mxu0 %v635_v22  ;;  %v617_v32 = vmax.f32 %v563_v25, 0.0  ;;  %v3267_v25 = vld [vmem:[#allocation6 + $0x38] sm:$0xff]  }
 0x232   :  { %v565_v28 = vpop.f32.mrf.mxu1  ;;  %2997 = vmatmul.mubr.bf16.gmra.mxu0 %v636_v23 }
 0x233   :  { %v566_v29 = vadd.f32 %v3536_v2, %v565_v28  ;;  %v620_v30 = vmax.f32 %v574_v26, 0.0 }
 0x234   :  { %v2958_v31 = vpop.f32.mrf.mxu1 }
 0x235   :  { %v618_v33 = vmax.f32 %v566_v29, 0.0  ;;  %v638_v37 = vpack.c.bf16 %v620_v30, %v619_v34  ;;  %v587_v41 = vadd.f32 %v2958_v31, %v3536_v2  ;;  %v3253_v29 = vld [vmem:[%s3914_s0 + $0x10] sm:$0xff]  }
 0x236   :  { %v578_v35 = vpop.f32.mrf.mxu1 }
 0x237   :  { %v637_v36 = vpack.c.bf16 %v618_v33, %v617_v32  ;;  %v579_v39 = vadd.f32 %v3536_v2, %v578_v35  ;;  %v623_v47 = vmax.f32 %v587_v41, 0.0  ;;  %v3268_v32 = vld [vmem:[#allocation6 + $0x30] sm:$0xff]   ;;  %v3254_v35 = vld [vmem:[%s3914_s0 + $0x18] sm:$0xff]  }
 0x238   :  { %v2959_v38 = vpop.f32.mrf.mxu1 }
 0x239   :  { %v590_v40 = vadd.f32 %v2959_v38, %v3536_v2  ;;  %3000 = vmatprep.mubr.bf16.mxu0 %v637_v36  ;;  %v621_v45 = vmax.f32 %v579_v39, 0.0  ;;  %v3255_v36 = vld [vmem:[%s3914_s0 + $0x20] sm:$0xff]   ;;  %v3256_v39 = vld [vmem:[%s3914_s0 + $0x28] sm:$0xff]  }
 0x23a   :  { %v581_v42 = vpop.f32.mrf.mxu1  ;;  %3001 = vmatmul.mubr.bf16.gmra.mxu0 %v638_v37 }
 0x23b   :  { %v582_v43 = vadd.f32 %v3536_v2, %v581_v42  ;;  %v624_v44 = vmax.f32 %v590_v40, 0.0  ;;  %v3257_v40 = vld [vmem:[%s3914_s0 + $0x30] sm:$0xff]  }
 0x23d   :  { %v622_v46 = vmax.f32 %v582_v43, 0.0  ;;  %v640_v49 = vpack.c.bf16 %v624_v44, %v623_v47  ;;  %v3258_v43 = vld [vmem:[%s3914_s0 + $0x38] sm:$0xff]  }
 0x23e   :  { %v3262_v47 = vld [vmem:[%s3914_s0 + $0x58] sm:$0xff]  }
 0x23f   :  { %v639_v48 = vpack.c.bf16 %v622_v46, %v621_v45  ;;  %v3260_v45 = vld [vmem:[%s3914_s0 + $0x48] sm:$0xff]   ;;  %v3261_v46 = vld [vmem:[%s3914_s0 + $0x50] sm:$0xff]  }
 0x241   :  { %3004 = vmatprep.mubr.bf16.mxu0 %v639_v48  ;;  %v3263_v48 = vld [vmem:[%s3914_s0 + $0x60] sm:$0xff]  }
 0x242   :  { %3005 = vmatmul.mubr.bf16.gmra.mxu0 %v640_v49  ;;  %v3264_v49 = vld [vmem:[%s3914_s0 + $0x68] sm:$0xff]  }
 0x243   :  { %3056 = vmatprep.mubr.bf16.mxu0 %v3259_v51  ;;  %v3266_v51 = vld [vmem:[%s3914_s0 + $0x78] sm:$0xff]  }
 0x2ca   :  { %v2978_v52 = vpop.f32.mrf.mxu0 }
 0x2cc   :  { %v739_v2 = vpop.f32.mrf.mxu0 }
 0x2ce   :  { %v2979_v53 = vpop.f32.mrf.mxu0 }
 0x2cf   :  { %v867_v20 = vpack.c.bf16 %v2979_v53, %v2978_v52  ;;  %v3269_v52 = vld [vmem:[#allocation6 + $0x28] sm:$0xff]   ;;  %v3271_v53 = vld [vmem:[#allocation6 + $0x18] sm:$0xff]  }
 0x2d0   :  { %v742_v54 = vpop.f32.mrf.mxu0 }
 0x2d1   :  { %v866_v23 = vpack.c.bf16 %v742_v54, %v739_v2  ;;  %v3270_v2 = vld [vmem:[#allocation6 + $0x20] sm:$0xff]   ;;  %v3272_v54 = vld [vmem:[#allocation6 + $0x10] sm:$0xff]  }
 0x2d2   :  { %v2982_v55 = vpop.f32.mrf.mxu0 }
 0x2d4   :  { %v755_v56 = vpop.f32.mrf.mxu0 }
 0x2d6   :  { %v2983_v57 = vpop.f32.mrf.mxu0 }
 0x2d7   :  { %v869_v14 = vpack.c.bf16 %v2983_v57, %v2982_v55  ;;  %v3273_v55 = vld [vmem:[#allocation6 + $0x8] sm:$0xff]  }
 0x2d8   :  { %v758_v58 = vpop.f32.mrf.mxu0 }
 0x2d9   :  { %v868_v17 = vpack.c.bf16 %v758_v58, %v755_v56  ;;  %v3274_v56 = vld [vmem:[#allocation6] sm:$0xff]  }
 0x2da   :  { %v2986_v59 = vpop.f32.mrf.mxu0  ;;  %v3633_v58 = vld [vmem:[%s3920_s6] ss:$0 sm:$0xff] }
 0x2dc   :  { %v771_v60 = vpop.f32.mrf.mxu0 }
 0x2de   :  { %v2987_v61 = vpop.f32.mrf.mxu0 }
 0x2df   :  { %v871_v8 = vpack.c.bf16 %v2987_v61, %v2986_v59 }
 0x2e0   :  { %v774_v62 = vpop.f32.mrf.mxu0 }
 0x2e1   :  { %v870_v11 = vpack.c.bf16 %v774_v62, %v771_v60 }
 0x2e2   :  { %v2990_v63 = vpop.f32.mrf.mxu0 }
 0x2e4   :  { %v787_v0 = vpop.f32.mrf.mxu0 }
 0x2e6   :  { %v2991_v1 = vpop.f32.mrf.mxu0 }
 0x2e7   :  { %v873_v3 = vpack.c.bf16 %v2991_v1, %v2990_v63 }
 0x2e8   :  { %v790_v4 = vpop.f32.mrf.mxu0 }
 0x2e9   :  { %v872_v5 = vpack.c.bf16 %v790_v4, %v787_v0  ;;  %3008 = vmatprep.subr.bf16.mxu1 %v873_v3 }
 0x2ea   :  { %v3576_v6 = vpop.f32.mrf.mxu0  ;;  %3009 = vmatpush3.bf16.msra.mxu1 %v873_v3 }
 0x2eb   :  { %3010 = vmatprep.subr.bf16.mxu1 %v872_v5 }
 0x2ec   :  { %v3578_v7 = vpop.f32.mrf.mxu0 }
 0x2ee   :  { %v3580_v9 = vpop.f32.mrf.mxu0  ;;  %3011 = vmatpush3.bf16.msra.mxu1 %v872_v5 }
 0x2ef   :  { %3012 = vmatprep.subr.bf16.mxu1 %v871_v8  ;;  %v875_v42 = vpack.c.bf16 %v3580_v9, %v3576_v6 }
 0x2f0   :  { %v3582_v10 = vpop.f32.mrf.mxu0 }
 0x2f1   :  { %v874_v44 = vpack.c.bf16 %v3582_v10, %v3578_v7 }
 0x2f2   :  { %v2998_v12 = vpop.f32.mrf.mxu0  ;;  %3013 = vmatpush3.bf16.msra.mxu1 %v871_v8 }
 0x2f3   :  { %3014 = vmatprep.subr.bf16.mxu1 %v870_v11 }
 0x2f4   :  { %v819_v13 = vpop.f32.mrf.mxu0 }
 0x2f6   :  { %v2999_v15 = vpop.f32.mrf.mxu0  ;;  %3015 = vmatpush3.bf16.msra.mxu1 %v870_v11 }
 0x2f7   :  { %3016 = vmatprep.subr.bf16.mxu1 %v869_v14  ;;  %v877_v38 = vpack.c.bf16 %v2999_v15, %v2998_v12 }
 0x2f8   :  { %v822_v16 = vpop.f32.mrf.mxu0 }
 0x2f9   :  { %v876_v41 = vpack.c.bf16 %v822_v16, %v819_v13 }
 0x2fa   :  { %v3002_v18 = vpop.f32.mrf.mxu0  ;;  %3017 = vmatpush3.bf16.msra.mxu1 %v869_v14 }
 0x2fb   :  { %3018 = vmatprep.subr.bf16.mxu1 %v868_v17 }
 0x2fc   :  { %v835_v19 = vpop.f32.mrf.mxu0 }
 0x2fe   :  { %v3003_v21 = vpop.f32.mrf.mxu0  ;;  %3019 = vmatpush3.bf16.msra.mxu1 %v868_v17 }
 0x2ff   :  { %3020 = vmatprep.subr.bf16.mxu1 %v867_v20  ;;  %v879_v34 = vpack.c.bf16 %v3003_v21, %v3002_v18 }
 0x300   :  { %v838_v22 = vpop.f32.mrf.mxu0 }
 0x301   :  { %v878_v37 = vpack.c.bf16 %v838_v22, %v835_v19 }
 0x302   :  { %v3006_v24 = vpop.f32.mrf.mxu0  ;;  %3021 = vmatpush3.bf16.msra.mxu1 %v867_v20 }
 0x303   :  { %3022 = vmatprep.subr.bf16.mxu1 %v866_v23 }
 0x304   :  { %v851_v26 = vpop.f32.mrf.mxu0 }
 0x306   :  { %v3007_v28 = vpop.f32.mrf.mxu0  ;;  %3023 = vmatpush3.bf16.msra.mxu1 %v866_v23 }
 0x307   :  { %v881_v30 = vpack.c.bf16 %v3007_v28, %v3006_v24  ;;  %3072 = vmatprep.subr.bf16.mxu1 %v3267_v25 }
 0x308   :  { %v854_v31 = vpop.f32.mrf.mxu0 }
 0x309   :  { %v880_v33 = vpack.c.bf16 %v854_v31, %v851_v26  ;;  %3025 = vmatmul.mubr.bf16.vlgmr.msra.gmra.mxu1 %v3252_v27  ;;  %3040 = vmatprep.subr.bf16.mxu0 %v881_v30 }
 0x30a   :  { %3041 = vmatpush3.bf16.msra.mxu0 %v881_v30  ;;  %3028 = vmatprep.mubr.bf16.mxu1 %v3253_v29 }
 0x30b   :  { %3042 = vmatprep.subr.bf16.mxu0 %v880_v33  ;;  %3073 = vmatpush3.bf16.msra.mxu1 %v3267_v25 }
 0x30c   :  { %3074 = vmatprep.subr.bf16.mxu1 %v3268_v32 }
 0x30e   :  { %3043 = vmatpush3.bf16.msra.mxu0 %v880_v33 }
 0x30f   :  { %3044 = vmatprep.subr.bf16.mxu0 %v879_v34  ;;  %3075 = vmatpush3.bf16.msra.mxu1 %v3268_v32 }
 0x310   :  { %3076 = vmatprep.subr.bf16.mxu1 %v3269_v52 }
 0x311   :  { %3029 = vmatmul.mubr.bf16.gmra.mxu1 %v3254_v35 }
 0x312   :  { %3045 = vmatpush3.bf16.msra.mxu0 %v879_v34  ;;  %3032 = vmatprep.mubr.bf16.mxu1 %v3255_v36 }
 0x313   :  { %3046 = vmatprep.subr.bf16.mxu0 %v878_v37  ;;  %3077 = vmatpush3.bf16.msra.mxu1 %v3269_v52 }
 0x314   :  { %3078 = vmatprep.subr.bf16.mxu1 %v3270_v2 }
 0x316   :  { %3047 = vmatpush3.bf16.msra.mxu0 %v878_v37 }
 0x317   :  { %3048 = vmatprep.subr.bf16.mxu0 %v877_v38  ;;  %3079 = vmatpush3.bf16.msra.mxu1 %v3270_v2 }
 0x318   :  { %3080 = vmatprep.subr.bf16.mxu1 %v3271_v53 }
 0x319   :  { %3033 = vmatmul.mubr.bf16.gmra.mxu1 %v3256_v39 }
 0x31a   :  { %3049 = vmatpush3.bf16.msra.mxu0 %v877_v38  ;;  %3036 = vmatprep.mubr.bf16.mxu1 %v3257_v40 }
 0x31b   :  { %3050 = vmatprep.subr.bf16.mxu0 %v876_v41  ;;  %3081 = vmatpush3.bf16.msra.mxu1 %v3271_v53 }
 0x31c   :  { %3082 = vmatprep.subr.bf16.mxu1 %v3272_v54 }
 0x31e   :  { %3051 = vmatpush3.bf16.msra.mxu0 %v876_v41 }
 0x31f   :  { %3052 = vmatprep.subr.bf16.mxu0 %v875_v42  ;;  %3083 = vmatpush3.bf16.msra.mxu1 %v3272_v54 }
 0x320   :  { %3084 = vmatprep.subr.bf16.mxu1 %v3273_v55 }
 0x321   :  { %3037 = vmatmul.mubr.bf16.gmra.mxu1 %v3258_v43 }
 0x322   :  { %3053 = vmatpush3.bf16.msra.mxu0 %v875_v42 }
 0x323   :  { %3054 = vmatprep.subr.bf16.mxu0 %v874_v44  ;;  %3085 = vmatpush3.bf16.msra.mxu1 %v3273_v55 }
 0x324   :  { %3086 = vmatprep.subr.bf16.mxu1 %v3274_v56 }
 0x326   :  { %3055 = vmatpush3.bf16.msra.mxu0 %v874_v44 }
 0x327   :  { %3087 = vmatpush3.bf16.msra.mxu1 %v3274_v56 }
 0x329   :  { %3057 = vmatmul.mubr.bf16.vlgmr.msra.gmra.mxu0 %v3260_v45 }
 0x32a   :  { %3060 = vmatprep.mubr.bf16.mxu0 %v3261_v46 }
 0x331   :  { %3061 = vmatmul.mubr.bf16.gmra.mxu0 %v3262_v47 }
 0x332   :  { %3064 = vmatprep.mubr.bf16.mxu0 %v3263_v48 }
 0x339   :  { %3065 = vmatmul.mubr.bf16.gmra.mxu0 %v3264_v49 }
 0x33a   :  { %3068 = vmatprep.mubr.bf16.mxu0 %v3265_v50 }
 0x341   :  { %3069 = vmatmul.mubr.bf16.gmra.mxu0 %v3266_v51 }
 0x3c9   :  { %v3026_v57 = vpop.f32.mrf.mxu1 }
 0x3ca   :  { %v995_v60 = vadd.f32 %v3026_v57, %v3633_v58 }
 0x3cb   :  { %v986_v59 = vpop.f32.mrf.mxu1 }
 0x3cc   :  { %v987_v62 = vadd.f32 %v3633_v58, %v986_v59  ;;  %v1051_v1 = vmax.f32 %v995_v60, 0.0 }
 0x3cd   :  { %v3027_v61 = vpop.f32.mrf.mxu1 }
 0x3ce   :  { %v998_v63 = vadd.f32 %v3027_v61, %v3633_v58  ;;  %v1049_v6 = vmax.f32 %v987_v62, 0.0 }
 0x3cf   :  { %v989_v0 = vpop.f32.mrf.mxu1 }
 0x3d0   :  { %v1052_v3 = vmax.f32 %v998_v63, 0.0  ;;  %v990_v4 = vadd.f32 %v3633_v58, %v989_v0 }
 0x3d1   :  { %v3030_v5 = vpop.f32.mrf.mxu1 }
 0x3d2   :  { %v2641_v7 = vpack.c.bf16 %v1052_v3, %v1051_v1  ;;  %v1050_v8 = vmax.f32 %v990_v4, 0.0  ;;  %v1011_v11 = vadd.f32 %v3030_v5, %v3633_v58 }
 0x3d3   :  { %v1002_v9 = vpop.f32.mrf.mxu1 }
 0x3d4   :  { %2713 = vst [vmem:[#allocation2 + $0x8] sm:$0xff] %v2641_v7   ;;  %v2636_v10 = vpack.c.bf16 %v1050_v8, %v1049_v6  ;;  %v1003_v13 = vadd.f32 %v3633_v58, %v1002_v9  ;;  %v1055_v16 = vmax.f32 %v1011_v11, 0.0 }
 0x3d5   :  { %v3031_v12 = vpop.f32.mrf.mxu1 }
 0x3d6   :  { %2637 = vst [vmem:[#allocation2] sm:$0xff] %v2636_v10   ;;  %v1014_v14 = vadd.f32 %v3031_v12, %v3633_v58  ;;  %v1053_v20 = vmax.f32 %v1003_v13, 0.0 }
 0x3d7   :  { %v1005_v15 = vpop.f32.mrf.mxu1 }
 0x3d8   :  { %v1056_v17 = vmax.f32 %v1014_v14, 0.0  ;;  %v1006_v18 = vadd.f32 %v3633_v58, %v1005_v15 }
 0x3d9   :  { %v3034_v19 = vpop.f32.mrf.mxu1 }
 0x3da   :  { %v2651_v21 = vpack.c.bf16 %v1056_v17, %v1055_v16  ;;  %v1054_v22 = vmax.f32 %v1006_v18, 0.0  ;;  %v1027_v25 = vadd.f32 %v3034_v19, %v3633_v58 }
 0x3db   :  { %v1018_v23 = vpop.f32.mrf.mxu1  ;;  %v3276_v30 = vld [vmem:[#allocation2 + $0x8] sm:$0xff]  }
 0x3dc   :  { %2715 = vst [vmem:[#allocation2 + $0x18] sm:$0xff] %v2651_v21   ;;  %v2646_v24 = vpack.c.bf16 %v1054_v22, %v1053_v20  ;;  %v1019_v28 = vadd.f32 %v3633_v58, %v1018_v23  ;;  %v1059_v32 = vmax.f32 %v1027_v25, 0.0 }
 0x3dd   :  { %v3035_v26 = vpop.f32.mrf.mxu1  ;;  %v3275_v27 = vld [vmem:[#allocation2] sm:$0xff]  }
 0x3de   :  { %2714 = vst [vmem:[#allocation2 + $0x10] sm:$0xff] %v2646_v24   ;;  %v1030_v29 = vadd.f32 %v3035_v26, %v3633_v58  ;;  %3088 = vmatprep.mubr.bf16.mxu1 %v3275_v27  ;;  %v1057_v36 = vmax.f32 %v1019_v28, 0.0 }
 0x3df   :  { %v1021_v31 = vpop.f32.mrf.mxu1  ;;  %3089 = vmatmul.mubr.bf16.vlgmr.msra.gmra.mxu1 %v3276_v30 }
 0x3e0   :  { %v1060_v33 = vmax.f32 %v1030_v29, 0.0  ;;  %v1022_v34 = vadd.f32 %v3633_v58, %v1021_v31 }
 0x3e1   :  { %v3038_v35 = vpop.f32.mrf.mxu1 }
 0x3e2   :  { %v2661_v37 = vpack.c.bf16 %v1060_v33, %v1059_v32  ;;  %v1058_v38 = vmax.f32 %v1022_v34, 0.0  ;;  %v1043_v41 = vadd.f32 %v3038_v35, %v3633_v58 }
 0x3e3   :  { %v1034_v39 = vpop.f32.mrf.mxu1  ;;  %v3278_v46 = vld [vmem:[#allocation2 + $0x18] sm:$0xff]  }
 0x3e4   :  { %2717 = vst [vmem:[#allocation2 + $0x28] sm:$0xff] %v2661_v37   ;;  %v2656_v40 = vpack.c.bf16 %v1058_v38, %v1057_v36  ;;  %v1035_v44 = vadd.f32 %v3633_v58, %v1034_v39  ;;  %v1063_v48 = vmax.f32 %v1043_v41, 0.0 }
 0x3e5   :  { %v3039_v42 = vpop.f32.mrf.mxu1  ;;  %v3277_v43 = vld [vmem:[#allocation2 + $0x10] sm:$0xff]  }
 0x3e6   :  { %2716 = vst [vmem:[#allocation2 + $0x20] sm:$0xff] %v2656_v40   ;;  %v1046_v45 = vadd.f32 %v3039_v42, %v3633_v58  ;;  %3092 = vmatprep.mubr.bf16.mxu1 %v3277_v43  ;;  %v1061_v52 = vmax.f32 %v1035_v44, 0.0 }
 0x3e7   :  { %v1037_v47 = vpop.f32.mrf.mxu1  ;;  %3093 = vmatmul.mubr.bf16.gmra.mxu1 %v3278_v46 }
 0x3e8   :  { %v1064_v49 = vmax.f32 %v1046_v45, 0.0  ;;  %v1038_v50 = vadd.f32 %v3633_v58, %v1037_v47 }
 0x3e9   :  { %v3058_v51 = vpop.f32.mrf.mxu0 }
 0x3ea   :  { %v2671_v2 = vpack.c.bf16 %v1064_v49, %v1063_v48  ;;  %v1062_v53 = vmax.f32 %v1038_v50, 0.0  ;;  %v1252_v56 = vadd.f32 %v3058_v51, %v3633_v58 }
 0x3eb   :  { %v1243_v54 = vpop.f32.mrf.mxu0  ;;  %v3280_v62 = vld [vmem:[#allocation2 + $0x28] sm:$0xff]  }
 0x3ec   :  { %2719 = vst [vmem:[#allocation2 + $0x38] sm:$0xff] %v2671_v2   ;;  %v2666_v55 = vpack.c.bf16 %v1062_v53, %v1061_v52  ;;  %v1244_v60 = vadd.f32 %v3633_v58, %v1243_v54  ;;  %v1308_v0 = vmax.f32 %v1252_v56, 0.0 }
 0x3ed   :  { %v3059_v57 = vpop.f32.mrf.mxu0  ;;  %v3279_v59 = vld [vmem:[#allocation2 + $0x20] sm:$0xff]  }
 0x3ee   :  { %2718 = vst [vmem:[#allocation2 + $0x30] sm:$0xff] %v2666_v55   ;;  %v1255_v61 = vadd.f32 %v3059_v57, %v3633_v58  ;;  %3096 = vmatprep.mubr.bf16.mxu1 %v3279_v59  ;;  %v1306_v5 = vmax.f32 %v1244_v60, 0.0  ;;  %v3291_v60 = vld [vmem:[%s3914_s0] sm:$0xff]  }
 0x3ef   :  { %v1246_v63 = vpop.f32.mrf.mxu0  ;;  %3097 = vmatmul.mubr.bf16.gmra.mxu1 %v3280_v62  ;;  %v1970_v62 = vld [vmem:[%s3916_s2] sm:$0xff]  ;;  %3136 = vmatprep.mubr.bf16.mxu0 %v3291_v60 }
 0x3f0   :  { %v1309_v1 = vmax.f32 %v1255_v61, 0.0  ;;  %v1247_v3 = vadd.f32 %v3633_v58, %v1246_v63  ;;  %v1972_v61 = vld [vmem:[%s3916_s2 + $0x10] sm:$0xff]  ;;  %v1973_v63 = vld [vmem:[%s3916_s2 + $0x18] sm:$0xff] }
 0x3f1   :  { %v3062_v4 = vpop.f32.mrf.mxu0 }
 0x3f2   :  { %v2681_v6 = vpack.c.bf16 %v1309_v1, %v1308_v0  ;;  %v1307_v7 = vmax.f32 %v1247_v3, 0.0  ;;  %v1268_v10 = vadd.f32 %v3062_v4, %v3633_v58  ;;  %v1971_v0 = vld [vmem:[%s3916_s2 + $0x8] sm:$0xff]  ;;  %v1974_v3 = vld [vmem:[%s3916_s2 + $0x20] sm:$0xff]  ;;  %v1977_v4 = vld [vmem:[%s3916_s2 + $0x38] sm:$0xff] }
 0x3f3   :  { %v1259_v8 = vpop.f32.mrf.mxu0  ;;  %v3282_v15 = vld [vmem:[#allocation2 + $0x38] sm:$0xff]   ;;  %v1975_v1 = vld [vmem:[%s3916_s2 + $0x28] sm:$0xff] }
 0x3f4   :  { %2721 = vst [vmem:[#allocation2 + $0x48] sm:$0xff] %v2681_v6   ;;  %v2676_v9 = vpack.c.bf16 %v1307_v7, %v1306_v5  ;;  %v1260_v13 = vadd.f32 %v3633_v58, %v1259_v8  ;;  %v1312_v17 = vmax.f32 %v1268_v10, 0.0  ;;  %v1976_v5 = vld [vmem:[%s3916_s2 + $0x30] sm:$0xff]  ;;  %v1979_v6 = vld [vmem:[%s3916_s2 + $0x48] sm:$0xff]  ;;  %v1978_v7 = vld [vmem:[%s3916_s2 + $0x40] sm:$0xff] }
 0x3f5   :  { %v3063_v11 = vpop.f32.mrf.mxu0  ;;  %v3281_v12 = vld [vmem:[#allocation2 + $0x30] sm:$0xff]   ;;  %v1981_v8 = vld [vmem:[%s3916_s2 + $0x58] sm:$0xff]  ;;  %v1983_v10 = vld [vmem:[%s3916_s2 + $0x68] sm:$0xff] }
 0x3f6   :  { %2720 = vst [vmem:[#allocation2 + $0x40] sm:$0xff] %v2676_v9   ;;  %v1271_v14 = vadd.f32 %v3063_v11, %v3633_v58  ;;  %3100 = vmatprep.mubr.bf16.mxu1 %v3281_v12  ;;  %v1310_v21 = vmax.f32 %v1260_v13, 0.0  ;;  %v1980_v9 = vld [vmem:[%s3916_s2 + $0x50] sm:$0xff]  ;;  %v1982_v11 = vld [vmem:[%s3916_s2 + $0x60] sm:$0xff]  ;;  %v1985_v12 = vld [vmem:[%s3916_s2 + $0x78] sm:$0xff] }
 0x3f7   :  { %v1262_v16 = vpop.f32.mrf.mxu0  ;;  %3101 = vmatmul.mubr.bf16.gmra.mxu1 %v3282_v15  ;;  %v1984_v13 = vld [vmem:[%s3916_s2 + $0x70] sm:$0xff]  ;;  %v2585_v15 = vld [vmem:[%s3916_s2 + $0x80] sm:$0xff] }
 0x3f8   :  { %v1313_v18 = vmax.f32 %v1271_v14, 0.0  ;;  %v1263_v19 = vadd.f32 %v3633_v58, %v1262_v16  ;;  %v2586_v14 = vld [vmem:[%s3916_s2 + $0x88] sm:$0xff]  ;;  %v3300_v16 = vld [vmem:[%s3914_s0 + $0x60] sm:$0xff]  }
 0x3f9   :  { %v3066_v20 = vpop.f32.mrf.mxu0 }
 0x3fa   :  { %v2691_v22 = vpack.c.bf16 %v1313_v18, %v1312_v17  ;;  %v1311_v23 = vmax.f32 %v1263_v19, 0.0  ;;  %v1284_v26 = vadd.f32 %v3066_v20, %v3633_v58  ;;  %v2588_v17 = vld [vmem:[%s3916_s2 + $0x98] sm:$0xff]  ;;  %v2587_v18 = vld [vmem:[%s3916_s2 + $0x90] sm:$0xff]  ;;  %v2590_v19 = vld [vmem:[%s3916_s2 + $0xa8] sm:$0xff] }
 0x3fb   :  { %v1275_v24 = vpop.f32.mrf.mxu0  ;;  %v3284_v31 = vld [vmem:[#allocation2 + $0x48] sm:$0xff]   ;;  %v2589_v20 = vld [vmem:[%s3916_s2 + $0xa0] sm:$0xff] }
 0x3fc   :  { %2723 = vst [vmem:[#allocation2 + $0x58] sm:$0xff] %v2691_v22   ;;  %v2686_v25 = vpack.c.bf16 %v1311_v23, %v1310_v21  ;;  %v1276_v29 = vadd.f32 %v3633_v58, %v1275_v24  ;;  %v1316_v33 = vmax.f32 %v1284_v26, 0.0  ;;  %v2592_v21 = vld [vmem:[%s3916_s2 + $0xb8] sm:$0xff]  ;;  %v2591_v22 = vld [vmem:[%s3916_s2 + $0xb0] sm:$0xff]  ;;  %v2594_v23 = vld [vmem:[%s3916_s2 + $0xc8] sm:$0xff] }
 0x3fd   :  { %v3067_v27 = vpop.f32.mrf.mxu0  ;;  %v3283_v28 = vld [vmem:[#allocation2 + $0x40] sm:$0xff]   ;;  %v2595_v26 = vld [vmem:[%s3916_s2 + $0xd0] sm:$0xff] }
 0x3fe   :  { %2722 = vst [vmem:[#allocation2 + $0x50] sm:$0xff] %v2686_v25   ;;  %v1287_v30 = vadd.f32 %v3067_v27, %v3633_v58  ;;  %3104 = vmatprep.mubr.bf16.mxu1 %v3283_v28  ;;  %v1314_v37 = vmax.f32 %v1276_v29, 0.0  ;;  %v2593_v24 = vld [vmem:[%s3916_s2 + $0xc0] sm:$0xff]  ;;  %v2596_v25 = vld [vmem:[%s3916_s2 + $0xd8] sm:$0xff]  ;;  %v2598_v27 = vld [vmem:[%s3916_s2 + $0xe8] sm:$0xff] }
 0x3ff   :  { %v1278_v32 = vpop.f32.mrf.mxu0  ;;  %3105 = vmatmul.mubr.bf16.gmra.mxu1 %v3284_v31  ;;  %v2597_v28 = vld [vmem:[%s3916_s2 + $0xe0] sm:$0xff]  ;;  %v2600_v29 = vld [vmem:[%s3916_s2 + $0xf8] sm:$0xff] }
 0x400   :  { %v1317_v34 = vmax.f32 %v1287_v30, 0.0  ;;  %v1279_v35 = vadd.f32 %v3633_v58, %v1278_v32  ;;  %v2599_v30 = vld [vmem:[%s3916_s2 + $0xf0] sm:$0xff] }
 0x401   :  { %v3070_v36 = vpop.f32.mrf.mxu0 }
 0x402   :  { %v2701_v38 = vpack.c.bf16 %v1317_v34, %v1316_v33  ;;  %v1315_v39 = vmax.f32 %v1279_v35, 0.0  ;;  %v1300_v42 = vadd.f32 %v3070_v36, %v3633_v58 }
 0x403   :  { %v1291_v40 = vpop.f32.mrf.mxu0  ;;  %v3286_v47 = vld [vmem:[#allocation2 + $0x58] sm:$0xff]  }
 0x404   :  { %2725 = vst [vmem:[#allocation2 + $0x68] sm:$0xff] %v2701_v38   ;;  %v2696_v41 = vpack.c.bf16 %v1315_v39, %v1314_v37  ;;  %v1292_v45 = vadd.f32 %v3633_v58, %v1291_v40  ;;  %v1320_v49 = vmax.f32 %v1300_v42, 0.0 }
 0x405   :  { %v3071_v43 = vpop.f32.mrf.mxu0  ;;  %v3285_v44 = vld [vmem:[#allocation2 + $0x50] sm:$0xff]  }
 0x406   :  { %2724 = vst [vmem:[#allocation2 + $0x60] sm:$0xff] %v2696_v41   ;;  %v1303_v46 = vadd.f32 %v3071_v43, %v3633_v58  ;;  %3108 = vmatprep.mubr.bf16.mxu1 %v3285_v44  ;;  %v1318_v52 = vmax.f32 %v1292_v45, 0.0 }
 0x407   :  { %v1294_v48 = vpop.f32.mrf.mxu0  ;;  %3109 = vmatmul.mubr.bf16.gmra.mxu1 %v3286_v47 }
 0x408   :  { %v1321_v50 = vmax.f32 %v1303_v46, 0.0  ;;  %v1295_v51 = vadd.f32 %v3633_v58, %v1294_v48  ;;  %v3377_v58 = vmov 0  }
 0x409   :  { %3210 = vset.pattern.permute.xlu1 %v3377_v58  ;;  %3209 = vset.pattern.permute.xlu0 %v3377_v58 }
 0x40a   :  { %v2711_v2 = vpack.c.bf16 %v1321_v50, %v1320_v49  ;;  %v1319_v53 = vmax.f32 %v1295_v51, 0.0  ;;  %1998 = vperm.xlu1 %3210, %v1972_v61   ;;  %1988 = vperm.xlu0 %3209, %v1970_v62  }
 0x40b   :  { %v3288_v56 = vld [vmem:[#allocation2 + $0x68] sm:$0xff]  }
 0x40c   :  { %2727 = vst [vmem:[#allocation2 + $0x78] sm:$0xff] %v2711_v2   ;;  %v2706_v54 = vpack.c.bf16 %v1319_v53, %v1318_v52 }
 0x40d   :  { %v3287_v55 = vld [vmem:[#allocation2 + $0x60] sm:$0xff]  }
 0x40e   :  { %2726 = vst [vmem:[#allocation2 + $0x70] sm:$0xff] %v2706_v54   ;;  %3112 = vmatprep.mubr.bf16.mxu1 %v3287_v55  ;;  %2003 = vperm.xlu1 %3210, %v1973_v63  }
 0x40f   :  { %3113 = vmatmul.mubr.bf16.gmra.mxu1 %v3288_v56  ;;  %1993 = vperm.xlu0 %3209, %v1971_v0  }
 0x412   :  { %2013 = vperm.xlu1 %3210, %v1975_v1  }
 0x413   :  { %v3290_v59 = vld [vmem:[#allocation2 + $0x78] sm:$0xff]   ;;  %2008 = vperm.xlu0 %3209, %v1974_v3  }
 0x415   :  { %v3289_v57 = vld [vmem:[#allocation2 + $0x70] sm:$0xff]  }
 0x416   :  { %3116 = vmatprep.mubr.bf16.mxu1 %v3289_v57  ;;  %2023 = vperm.xlu1 %3210, %v1977_v4  }
 0x417   :  { %3117 = vmatmul.mubr.bf16.gmra.mxu1 %v3290_v59  ;;  %2018 = vperm.xlu0 %3209, %v1976_v5   ;;  %v3292_v5 = vld [vmem:[%s3914_s0 + $0x8] sm:$0xff]  }
 0x418   :  { %3176 = vmatprep.mubr.bf16.mxu1 %v3300_v16  ;;  %v3296_v16 = vld [vmem:[%s3914_s0 + $0x28] sm:$0xff]  }
 0x41a   :  { %2033 = vperm.xlu1 %3210, %v1979_v6  }
 0x41b   :  { %2028 = vperm.xlu0 %3209, %v1978_v7  }
 0x41e   :  { %2043 = vperm.xlu1 %3210, %v1981_v8  }
 0x41f   :  { %2038 = vperm.xlu0 %3209, %v1980_v9   ;;  %v3293_v9 = vld [vmem:[%s3914_s0 + $0x10] sm:$0xff]  }
 0x422   :  { %2053 = vperm.xlu1 %3210, %v1983_v10  }
 0x423   :  { %2048 = vperm.xlu0 %3209, %v1982_v11  }
 0x426   :  { %2063 = vperm.xlu1 %3210, %v1985_v12   ;;  %v3294_v12 = vld [vmem:[%s3914_s0 + $0x18] sm:$0xff]  }
 0x427   :  { %2058 = vperm.xlu0 %3209, %v1984_v13   ;;  %v3295_v13 = vld [vmem:[%s3914_s0 + $0x20] sm:$0xff]  }
 0x42a   :  { %2315 = vperm.xlu1 %3210, %v2586_v14  }
 0x42b   :  { %2310 = vperm.xlu0 %3209, %v2585_v15  }
 0x42e   :  { %2325 = vperm.xlu1 %3210, %v2588_v17   ;;  %v3297_v17 = vld [vmem:[%s3914_s0 + $0x30] sm:$0xff]  }
 0x42f   :  { %2320 = vperm.xlu0 %3209, %v2587_v18  }
 0x432   :  { %2335 = vperm.xlu1 %3210, %v2590_v19  }
 0x433   :  { %2330 = vperm.xlu0 %3209, %v2589_v20   ;;  %v3298_v20 = vld [vmem:[%s3914_s0 + $0x38] sm:$0xff]  }
 0x436   :  { %2345 = vperm.xlu1 %3210, %v2592_v21   ;;  %v3299_v21 = vld [vmem:[%s3914_s0 + $0x40] sm:$0xff]  }
 0x437   :  { %2340 = vperm.xlu0 %3209, %v2591_v22  }
 0x43a   :  { %2355 = vperm.xlu1 %3210, %v2594_v23   ;;  %v3301_v23 = vld [vmem:[%s3914_s0 + $0x48] sm:$0xff]  }
 0x43b   :  { %2350 = vperm.xlu0 %3209, %v2593_v24   ;;  %v3302_v24 = vld [vmem:[%s3914_s0 + $0x68] sm:$0xff]  }
 0x43e   :  { %2365 = vperm.xlu1 %3210, %v2596_v25   ;;  %v3303_v25 = vld [vmem:[%s3914_s0 + $0x50] sm:$0xff]  }
 0x43f   :  { %2360 = vperm.xlu0 %3209, %v2595_v26   ;;  %v3304_v26 = vld [vmem:[%s3914_s0 + $0x70] sm:$0xff]  }
 0x442   :  { %2375 = vperm.xlu1 %3210, %v2598_v27   ;;  %v3305_v27 = vld [vmem:[%s3914_s0 + $0x58] sm:$0xff]  }
 0x443   :  { %2370 = vperm.xlu0 %3209, %v2597_v28   ;;  %v3306_v28 = vld [vmem:[%s3914_s0 + $0x78] sm:$0xff]  }
 0x446   :  { %2385 = vperm.xlu1 %3210, %v2600_v29  }
 0x447   :  { %2380 = vperm.xlu0 %3209, %v2599_v30  }
 0x485   :  { %v1989_v29 = vpop.permute.xlu0 %1988  ;;  %v1999_v30 = vpop.permute.xlu1 %1998 }
 0x49f   :  { %v3090_v31 = vpop.f32.mrf.mxu1 }
 0x4a1   :  { %v1628_v32 = vpop.f32.mrf.mxu1 }
 0x4a3   :  { %v3091_v33 = vpop.f32.mrf.mxu1 }
 0x4a4   :  { %v1756_v62 = vpack.c.bf16 %v3091_v33, %v3090_v31  ;;  %v1994_v31 = vpop.permute.xlu0 %1993 }
 0x4a5   :  { %v1631_v34 = vpop.f32.mrf.mxu1 }
 0x4a6   :  { %v1755_v1 = vpack.c.bf16 %v1631_v34, %v1628_v32  ;;  %v2004_v32 = vpop.permute.xlu1 %2003 }
 0x4a7   :  { %v3094_v35 = vpop.f32.mrf.mxu1 }
 0x4a8   :  { %v2009_v33 = vpop.permute.xlu0 %2008 }
 0x4a9   :  { %v1644_v36 = vpop.f32.mrf.mxu1 }
 0x4aa   :  { %v3823_v34 = vpop.permute.xlu1 %2013 }
 0x4ab   :  { %v3095_v37 = vpop.f32.mrf.mxu1 }
 0x4ac   :  { %v1758_v56 = vpack.c.bf16 %v3095_v37, %v3094_v35  ;;  %v2019_v35 = vpop.permute.xlu0 %2018 }
 0x4ad   :  { %v1647_v38 = vpop.f32.mrf.mxu1 }
 0x4ae   :  { %v1757_v60 = vpack.c.bf16 %v1647_v38, %v1644_v36  ;;  %v2024_v36 = vpop.permute.xlu1 %2023 }
 0x4af   :  { %v3098_v39 = vpop.f32.mrf.mxu1 }
 0x4b0   :  { %v2029_v37 = vpop.permute.xlu0 %2028 }
 0x4b1   :  { %v1660_v40 = vpop.f32.mrf.mxu1 }
 0x4b2   :  { %v2034_v38 = vpop.permute.xlu1 %2033 }
 0x4b3   :  { %v3099_v41 = vpop.f32.mrf.mxu1 }
 0x4b4   :  { %v1760_v51 = vpack.c.bf16 %v3099_v41, %v3098_v39  ;;  %v2039_v39 = vpop.permute.xlu0 %2038 }
 0x4b5   :  { %v1663_v42 = vpop.f32.mrf.mxu1 }
 0x4b6   :  { %v1759_v53 = vpack.c.bf16 %v1663_v42, %v1660_v40  ;;  %v2044_v40 = vpop.permute.xlu1 %2043 }
 0x4b7   :  { %v3102_v43 = vpop.f32.mrf.mxu1 }
 0x4b8   :  { %v3825_v41 = vpop.permute.xlu0 %2048 }
 0x4b9   :  { %v1676_v44 = vpop.f32.mrf.mxu1 }
 0x4ba   :  { %v3827_v42 = vpop.permute.xlu1 %2053 }
 0x4bb   :  { %v3103_v45 = vpop.f32.mrf.mxu1 }
 0x4bc   :  { %v1762_v46 = vpack.c.bf16 %v3103_v45, %v3102_v43  ;;  %v3829_v43 = vpop.permute.xlu0 %2058 }
 0x4bd   :  { %v1679_v47 = vpop.f32.mrf.mxu1 }
 0x4be   :  { %v1761_v48 = vpack.c.bf16 %v1679_v47, %v1676_v44  ;;  %3120 = vmatprep.subr.bf16.mxu0 %v1762_v46  ;;  %v3831_v44 = vpop.permute.xlu1 %2063 }
 0x4bf   :  { %v3769_v49 = vpop.f32.mrf.mxu1  ;;  %3121 = vmatpush3.bf16.msra.mxu0 %v1762_v46 }
 0x4c0   :  { %3122 = vmatprep.subr.bf16.mxu0 %v1761_v48  ;;  %v3833_v46 = vpop.permute.xlu0 %2310 }
 0x4c1   :  { %v3771_v50 = vpop.f32.mrf.mxu1 }
 0x4c3   :  { %v3773_v52 = vpop.f32.mrf.mxu1  ;;  %3123 = vmatpush3.bf16.msra.mxu0 %v1761_v48 }
 0x4c4   :  { %3124 = vmatprep.subr.bf16.mxu0 %v1760_v51  ;;  %v1764_v19 = vpack.c.bf16 %v3773_v52, %v3769_v49  ;;  %v3835_v49 = vpop.permute.xlu1 %2315 }
 0x4c5   :  { %v3775_v2 = vpop.f32.mrf.mxu1 }
 0x4c6   :  { %v1763_v22 = vpack.c.bf16 %v3775_v2, %v3771_v50 }
 0x4c7   :  { %v3110_v54 = vpop.f32.mrf.mxu1  ;;  %3125 = vmatpush3.bf16.msra.mxu0 %v1760_v51  ;;  %v2321_v51 = vpop.permute.xlu0 %2320 }
 0x4c8   :  { %3126 = vmatprep.subr.bf16.mxu0 %v1759_v53 }
 0x4c9   :  { %v1708_v55 = vpop.f32.mrf.mxu1 }
 0x4cb   :  { %v3111_v57 = vpop.f32.mrf.mxu1  ;;  %3127 = vmatpush3.bf16.msra.mxu0 %v1759_v53  ;;  %v3837_v53 = vpop.permute.xlu1 %2325 }
 0x4cc   :  { %3128 = vmatprep.subr.bf16.mxu0 %v1758_v56  ;;  %v1766_v15 = vpack.c.bf16 %v3111_v57, %v3110_v54 }
 0x4cd   :  { %v1711_v59 = vpop.f32.mrf.mxu1 }
 0x4ce   :  { %v1765_v18 = vpack.c.bf16 %v1711_v59, %v1708_v55  ;;  %v3839_v55 = vpop.permute.xlu0 %2330 }
 0x4cf   :  { %v3114_v58 = vpop.f32.mrf.mxu1  ;;  %3129 = vmatpush3.bf16.msra.mxu0 %v1758_v56  ;;  %v3841_v59 = vpop.permute.xlu1 %2335 }
 0x4d0   :  { %3130 = vmatprep.subr.bf16.mxu0 %v1757_v60 }
 0x4d1   :  { %v1724_v61 = vpop.f32.mrf.mxu1 }
 0x4d3   :  { %v3115_v63 = vpop.f32.mrf.mxu1  ;;  %3131 = vmatpush3.bf16.msra.mxu0 %v1757_v60 }
 0x4d4   :  { %3132 = vmatprep.subr.bf16.mxu0 %v1756_v62  ;;  %v1768_v11 = vpack.c.bf16 %v3115_v63, %v3114_v58  ;;  %v3843_v58 = vpop.permute.xlu0 %2340 }
 0x4d5   :  { %v1727_v0 = vpop.f32.mrf.mxu1 }
 0x4d6   :  { %v1767_v14 = vpack.c.bf16 %v1727_v0, %v1724_v61  ;;  %v3848_v61 = vld [vmem:[%s3922_s8] ss:$0 sm:$0xff]  ;;  %s3378_s8 = smov [#allocation8]  }
 0x4d7   :  { %v3118_v3 = vpop.f32.mrf.mxu1  ;;  %3133 = vmatpush3.bf16.msra.mxu0 %v1756_v62  ;;  %s2441_s30 = sshll.u32 %s3378_s8, 4  ;;  %s2442_s30 = int_to_ptr.vmem [resolvable:$true] %s2441_s30 }
 0x4d8   :  { %3134 = vmatprep.subr.bf16.mxu0 %v1755_v1  ;;  %s3347_s10 = scalar_lea.vmem %s2442_s30, 2048  ;;  %p3352_p11 = scmp.lt.s32.totalorder %s2442_s30, %s2442_s30 }
 0x4d9   :  { %v1740_v4 = vpop.f32.mrf.mxu1  ;;  %p3348_p10 = scmp.ne.s32.totalorder %s2442_s30, %s3347_s10  ;;  %p3353_p12 = scmp.lt.s32.totalorder %s3347_s10, %s3347_s10 }
 0x4db   :  { %v3119_v6 = vpop.f32.mrf.mxu1  ;;  %3135 = vmatpush3.bf16.msra.mxu0 %v1755_v1  ;;  %v3851_v1 = vpop.permute.xlu1 %2345  ;;  %p3354_p13 = por %p3353_p12, %p3352_p11 }
 0x4dc   :  { %v1770_v7 = vpack.c.bf16 %v3119_v6, %v3118_v3 }
 0x4dd   :  { %v1743_v8 = vpop.f32.mrf.mxu1  ;;  %p3355_p0 = pnand %p3354_p13, %p3348_p10 }
 0x4de   :  { %v1769_v10 = vpack.c.bf16 %v1743_v8, %v1740_v4  ;;  %3137 = vmatmul.mubr.bf16.vlgmr.msra.gmra.mxu0 %v3292_v5  ;;  %3152 = vmatprep.subr.bf16.mxu0 %v1770_v7  ;;  %v2351_v8 = vpop.permute.xlu0 %2350 }
 0x4df   :  { %3184 = vmatprep.subr.bf16.mxu1 %v1770_v7  ;;  %3153 = vmatpush3.bf16.msra.mxu0 %v1770_v7 }
 0x4e0   :  { %3192 = vmatpush3.bf16.msra.mxu1 %v1770_v7  ;;  %3154 = vmatprep.subr.bf16.mxu0 %v1769_v10 }
 0x4e1   :  { %3185 = vmatprep.subr.bf16.mxu1 %v1769_v10  ;;  %3140 = vmatprep.mubr.bf16.mxu0 %v3293_v9 }
 0x4e3   :  { %3155 = vmatpush3.bf16.msra.mxu0 %v1769_v10 }
 0x4e4   :  { %3193 = vmatpush3.bf16.msra.mxu1 %v1769_v10  ;;  %3156 = vmatprep.subr.bf16.mxu0 %v1768_v11 }
 0x4e5   :  { %3186 = vmatprep.subr.bf16.mxu1 %v1768_v11 }
 0x4e6   :  { %3141 = vmatmul.mubr.bf16.gmra.mxu0 %v3294_v12 }
 0x4e7   :  { %3157 = vmatpush3.bf16.msra.mxu0 %v1768_v11  ;;  %3144 = vmatprep.mubr.bf16.mxu0 %v3295_v13 }
 0x4e8   :  { %3194 = vmatpush3.bf16.msra.mxu1 %v1768_v11  ;;  %3158 = vmatprep.subr.bf16.mxu0 %v1767_v14 }
 0x4e9   :  { %3187 = vmatprep.subr.bf16.mxu1 %v1767_v14 }
 0x4eb   :  { %3159 = vmatpush3.bf16.msra.mxu0 %v1767_v14 }
 0x4ec   :  { %3195 = vmatpush3.bf16.msra.mxu1 %v1767_v14  ;;  %3160 = vmatprep.subr.bf16.mxu0 %v1766_v15 }
 0x4ed   :  { %3188 = vmatprep.subr.bf16.mxu1 %v1766_v15 }
 0x4ee   :  { %3145 = vmatmul.mubr.bf16.gmra.mxu0 %v3296_v16 }
 0x4ef   :  { %3161 = vmatpush3.bf16.msra.mxu0 %v1766_v15  ;;  %3148 = vmatprep.mubr.bf16.mxu0 %v3297_v17 }
 0x4f0   :  { %3196 = vmatpush3.bf16.msra.mxu1 %v1766_v15  ;;  %3162 = vmatprep.subr.bf16.mxu0 %v1765_v18 }
 0x4f1   :  { %3189 = vmatprep.subr.bf16.mxu1 %v1765_v18 }
 0x4f3   :  { %3163 = vmatpush3.bf16.msra.mxu0 %v1765_v18 }
 0x4f4   :  { %3197 = vmatpush3.bf16.msra.mxu1 %v1765_v18  ;;  %3164 = vmatprep.subr.bf16.mxu0 %v1764_v19 }
 0x4f5   :  { %3190 = vmatprep.subr.bf16.mxu1 %v1764_v19 }
 0x4f6   :  { %3149 = vmatmul.mubr.bf16.gmra.mxu0 %v3298_v20  ;;  %v2356_v20 = vpop.permute.xlu1 %2355 }
 0x4f7   :  { %3165 = vmatpush3.bf16.msra.mxu0 %v1764_v19  ;;  %3168 = vmatprep.mubr.bf16.mxu0 %v3299_v21 }
 0x4f8   :  { %3198 = vmatpush3.bf16.msra.mxu1 %v1764_v19  ;;  %3166 = vmatprep.subr.bf16.mxu0 %v1763_v22 }
 0x4f9   :  { %3191 = vmatprep.subr.bf16.mxu1 %v1763_v22 }
 0x4fb   :  { %3167 = vmatpush3.bf16.msra.mxu0 %v1763_v22 }
 0x4fc   :  { %3199 = vmatpush3.bf16.msra.mxu1 %v1763_v22 }
 0x4fe   :  { %3169 = vmatmul.mubr.bf16.vlgmr.msra.gmra.mxu0 %v3301_v23 }
 0x4ff   :  { %3177 = vmatmul.mubr.bf16.vlgmr.msra.gmra.mxu1 %v3302_v24  ;;  %3172 = vmatprep.mubr.bf16.mxu0 %v3303_v25 }
 0x500   :  { %3180 = vmatprep.mubr.bf16.mxu1 %v3304_v26  ;;  %v2361_v26 = vpop.permute.xlu0 %2360 }
 0x506   :  { %3173 = vmatmul.mubr.bf16.gmra.mxu0 %v3305_v27 }
 0x507   :  { %3181 = vmatmul.mubr.bf16.gmra.mxu1 %v3306_v28 }
 0x59e   :  { %v3138_v45 = vpop.f32.mrf.mxu0 }
 0x59f   :  { %v1900_v0 = vadd.f32 %v3138_v45, %v3848_v61 }
 0x5a0   :  { %v1891_v47 = vpop.f32.mrf.mxu0 }
 0x5a1   :  { %v1892_v3 = vadd.f32 %v3848_v61, %v1891_v47  ;;  %v2068_v11 = vmul.f32 %v1999_v30, %v1900_v0 }
 0x5a2   :  { %v3139_v48 = vpop.f32.mrf.mxu0 }
 0x5a3   :  { %v1903_v4 = vadd.f32 %v3139_v48, %v3848_v61  ;;  %v2066_v13 = vmul.f32 %v1989_v29, %v1892_v3 }
 0x5a4   :  { %v1894_v50 = vpop.f32.mrf.mxu0 }
 0x5a5   :  { %v1895_v6 = vadd.f32 %v3848_v61, %v1894_v50  ;;  %v2069_v14 = vmul.f32 %v2004_v32, %v1903_v4  ;;  %v2366_v50 = vpop.permute.xlu1 %2365 }
 0x5a6   :  { %v3142_v52 = vpop.f32.mrf.mxu0 }
 0x5a7   :  { %v1916_v7 = vadd.f32 %v3142_v52, %v3848_v61  ;;  %v3861_v18 = vmul.f32 %v1994_v31, %v1895_v6 }
 0x5a8   :  { %v1907_v2 = vpop.f32.mrf.mxu0 }
 0x5a9   :  { %v1908_v9 = vadd.f32 %v3848_v61, %v1907_v2  ;;  %v3863_v19 = vmul.f32 %v2019_v35, %v1916_v7 }
 0x5aa   :  { %v3143_v54 = vpop.f32.mrf.mxu0 }
 0x5ab   :  { %v3865_v21 = vmul.f32 %v2009_v33, %v1908_v9  ;;  %v1919_v22 = vadd.f32 %v3143_v54, %v3848_v61 }
 0x5ac   :  { %v1910_v56 = vpop.f32.mrf.mxu0 }
 0x5ad   :  { %v1911_v23 = vadd.f32 %v3848_v61, %v1910_v56  ;;  %v3871_v35 = vmul.f32 %v2024_v36, %v1919_v22  ;;  %v2371_v36 = vpop.permute.xlu0 %2370 }
 0x5ae   :  { %v3146_v57 = vpop.f32.mrf.mxu0 }
 0x5af   :  { %v1932_v12 = vadd.f32 %v3146_v57, %v3848_v61  ;;  %v3874_v33 = vmul.f32 %v3823_v34, %v1911_v23 }
 0x5b0   :  { %v1923_v60 = vpop.f32.mrf.mxu0 }
 0x5b1   :  { %v1924_v15 = vadd.f32 %v3848_v61, %v1923_v60  ;;  %v2076_v27 = vmul.f32 %v2039_v39, %v1932_v12 }
 0x5b2   :  { %v3147_v62 = vpop.f32.mrf.mxu0 }
 0x5b3   :  { %v1935_v16 = vadd.f32 %v3147_v62, %v3848_v61  ;;  %v2074_v28 = vmul.f32 %v2029_v37, %v1924_v15  ;;  %v2376_v15 = vpop.permute.xlu1 %2375 }
 0x5b4   :  { %v1926_v63 = vpop.f32.mrf.mxu0 }
 0x5b5   :  { %v1927_v24 = vadd.f32 %v3848_v61, %v1926_v63  ;;  %v2077_v29 = vmul.f32 %v2044_v40, %v1935_v16 }
 0x5b6   :  { %v3150_v5 = vpop.f32.mrf.mxu0 }
 0x5b7   :  { %v2075_v45 = vmul.f32 %v2034_v38, %v1927_v24  ;;  %v1948_v52 = vadd.f32 %v3150_v5, %v3848_v61 }
 0x5b8   :  { %v1939_v10 = vpop.f32.mrf.mxu0 }
 0x5b9   :  { %v1940_v57 = vadd.f32 %v3848_v61, %v1939_v10  ;;  %v2080_v4 = vmul.f32 %v3829_v43, %v1948_v52 }
 0x5ba   :  { %v3151_v17 = vpop.f32.mrf.mxu0 }
 0x5bb   :  { %v1951_v10 = vadd.f32 %v3151_v17, %v3848_v61  ;;  %v2078_v16 = vmul.f32 %v3825_v41, %v1940_v57 }
 0x5bc   :  { %v1942_v25 = vpop.f32.mrf.mxu0 }
 0x5bd   :  { %v1943_v23 = vadd.f32 %v3848_v61, %v1942_v25 }
 0x5be   :  { %v3170_v30 = vpop.f32.mrf.mxu0 }
 0x5bf   :  { %v2221_v31 = vadd.f32 %v3170_v30, %v3848_v61  ;;  %v3178_v32 = vpop.f32.mrf.mxu1 }
 0x5c0   :  { %v2253_v47 = vadd.f32 %v3178_v32, %v3848_v61  ;;  %v2212_v48 = vpop.f32.mrf.mxu0 }
 0x5c1   :  { %v2390_v2 = vmul.f32 %v2321_v51, %v2221_v31  ;;  %v2213_v37 = vadd.f32 %v3848_v61, %v2212_v48  ;;  %v2244_v39 = vpop.f32.mrf.mxu1  ;;  %v2081_v31 = vmul.f32 %v3831_v44, %v1951_v10 }
 0x5c2   :  { %v2398_v40 = vmul.f32 %v2361_v26, %v2253_v47  ;;  %v2245_v54 = vadd.f32 %v3848_v61, %v2244_v39  ;;  %v3171_v56 = vpop.f32.mrf.mxu0 }
 0x5c3   :  { %v2406_v34 = vadd.f32 %v2390_v2, %v2068_v11  ;;  %v2388_v38 = vmul.f32 %v3833_v46, %v2213_v37  ;;  %v2224_v60 = vadd.f32 %v3171_v56, %v3848_v61  ;;  %v3179_v62 = vpop.f32.mrf.mxu1  ;;  %v2386_v37 = vpop.permute.xlu1 %2385 }
 0x5c4   :  { %v2414_v63 = vadd.f32 %v2398_v40, %v2076_v27  ;;  %v2396_v0 = vmul.f32 %v2351_v8, %v2245_v54  ;;  %v2256_v51 = vadd.f32 %v3179_v62, %v3848_v61  ;;  %v2215_v3 = vpop.f32.mrf.mxu0 }
 0x5c5   :  { %2422 = vst [vmem:[#allocation8 + $0x10] sm:$0xff] %v2406_v34  ;;  %v2404_v5 = vadd.f32 %v2388_v38, %v2066_v13  ;;  %v2391_v6 = vmul.f32 %v3837_v53, %v2224_v60  ;;  %v2216_v7 = vadd.f32 %v3848_v61, %v2215_v3  ;;  %v2247_v9 = vpop.f32.mrf.mxu1 }
 0x5c6   :  { %2430 = vst [vmem:[#allocation8 + $0x50] sm:$0xff] %v2414_v63  ;;  %v2412_v46 = vadd.f32 %v2396_v0, %v2074_v28  ;;  %v2399_v11 = vmul.f32 %v2366_v50, %v2256_v51  ;;  %v2248_v12 = vadd.f32 %v3848_v61, %v2247_v9  ;;  %v3174_v8 = vpop.f32.mrf.mxu0  ;;  %v2381_v28 = vpop.permute.xlu0 %2380 }
 0x5c7   :  { %2420 = vst [vmem:[#allocation8] sm:$0xff] %v2404_v5  ;;  %v2407_v43 = vadd.f32 %v2391_v6, %v2069_v14  ;;  %v2389_v13 = vmul.f32 %v3835_v49, %v2216_v7  ;;  %v2237_v53 = vadd.f32 %v3174_v8, %v3848_v61  ;;  %v3182_v22 = vpop.f32.mrf.mxu1 }
 0x5c8   :  { %2428 = vst [vmem:[#allocation8 + $0x40] sm:$0xff] %v2412_v46  ;;  %v2415_v17 = vadd.f32 %v2399_v11, %v2077_v29  ;;  %v2397_v24 = vmul.f32 %v2356_v20, %v2248_v12  ;;  %v2269_v26 = vadd.f32 %v3182_v22, %v3848_v61  ;;  %v2228_v27 = vpop.f32.mrf.mxu0 }
 0x5c9   :  { %2423 = vst [vmem:[#allocation8 + $0x18] sm:$0xff] %v2407_v43  ;;  %v2405_v30 = vadd.f32 %v2389_v13, %v3861_v18  ;;  %v2394_v41 = vmul.f32 %v3843_v58, %v2237_v53  ;;  %v2229_v14 = vadd.f32 %v3848_v61, %v2228_v27  ;;  %v2260_v49 = vpop.f32.mrf.mxu1  ;;  %v2079_v58 = vmul.f32 %v3827_v42, %v1943_v23 }
 0x5ca   :  { %2431 = vst [vmem:[#allocation8 + $0x58] sm:$0xff] %v2415_v17  ;;  %v2413_v32 = vadd.f32 %v2397_v24, %v2075_v45  ;;  %v2402_v25 = vmul.f32 %v2381_v28, %v2269_v26  ;;  %v2261_v29 = vadd.f32 %v3848_v61, %v2260_v49  ;;  %v3175_v20 = vpop.f32.mrf.mxu0 }
 0x5cb   :  { %2421 = vst [vmem:[#allocation8 + $0x8] sm:$0xff] %v2405_v30  ;;  %v2410_v47 = vadd.f32 %v2394_v41, %v3863_v19  ;;  %v2392_v48 = vmul.f32 %v3839_v55, %v2229_v14  ;;  %v2240_v18 = vadd.f32 %v3175_v20, %v3848_v61  ;;  %v3183_v50 = vpop.f32.mrf.mxu1 }
 0x5cc   :  { %2429 = vst [vmem:[#allocation8 + $0x48] sm:$0xff] %v2413_v32  ;;  %v2418_v52 = vadd.f32 %v2402_v25, %v2080_v4  ;;  %v2400_v2 = vmul.f32 %v2371_v36, %v2261_v29  ;;  %v2272_v44 = vadd.f32 %v3183_v50, %v3848_v61  ;;  %v2231_v45 = vpop.f32.mrf.mxu0 }
 0x5cd   :  { %2426 = vst [vmem:[#allocation8 + $0x30] sm:$0xff] %v2410_v47  ;;  %v2408_v39 = vadd.f32 %v2392_v48, %v3865_v21  ;;  %v2395_v40 = vmul.f32 %v3851_v1, %v2240_v18  ;;  %v2232_v19 = vadd.f32 %v3848_v61, %v2231_v45  ;;  %v2263_v55 = vpop.f32.mrf.mxu1 }
 0x5ce   :  { %2434 = vst [vmem:[#allocation8 + $0x70] sm:$0xff] %v2418_v52  ;;  %v2416_v54 = vadd.f32 %v2400_v2, %v2078_v16  ;;  %v2403_v56 = vmul.f32 %v2386_v37, %v2272_v44  ;;  %v2264_v42 = vadd.f32 %v3848_v61, %v2263_v55 }
 0x5cf   :  { %2424 = vst [vmem:[#allocation8 + $0x20] sm:$0xff] %v2408_v39  ;;  %v2411_v36 = vadd.f32 %v2395_v40, %v3871_v35  ;;  %v2393_v57 = vmul.f32 %v3841_v59, %v2232_v19 }
 0x5d0   :  { %2432 = vst [vmem:[#allocation8 + $0x60] sm:$0xff] %v2416_v54  ;;  %v2419_v34 = vadd.f32 %v2403_v56, %v2081_v31  ;;  %v2401_v21 = vmul.f32 %v2376_v15, %v2264_v42 }
 0x5d1   :  { %2427 = vst [vmem:[#allocation8 + $0x38] sm:$0xff] %v2411_v36  ;;  %v2409_v1 = vadd.f32 %v2393_v57, %v3874_v33 }
 0x5d2   :  { %2435 = vst [vmem:[#allocation8 + $0x78] sm:$0xff] %v2419_v34  ;;  %v2417_v38 = vadd.f32 %v2401_v21, %v2079_v58 }
 0x5d3   :  { %2425 = vst [vmem:[#allocation8 + $0x28] sm:$0xff] %v2409_v1 }
 0x5d4   :  { %2433 = vst [vmem:[#allocation8 + $0x68] sm:$0xff] %v2417_v38 }
 0x5d5   :  { %3358 = shalt.err (!%p3355_p0)
}
 0x5d6   :  { %s3379_s11 = smov 128   ;;  %s3380_s12 = smov 8  }
 0x5d7   :  { %2447 = dma.vmem_to_hbm [thread:$0]  %s2442_s30, 2048, %s3923_s9, [#allocation5], %s3379_s11, %s3379_s11, %s3380_s12  }
 0x5d8   :  { %3371 = dma.done.wait [#allocation5], 2048  }
 0x5d9   :  { %3372 = vsyncadd [#allocation5], 4294965248 }
 0x5da   :  { %2451 = vsyncpa [#allocation4], 1 }
 0x5db   :  { %2452 = vsyncpa [#allocation7], 1 }
 0x5dc   :  { %2453 = vsyncpa [#allocation5], 1 }

</bundles_post_ra>
